<compile_context>
chip_gen: v7x
topology: tpu7x:2x2x1
jax: 0.10.0
libtpu: 0.0.40
codegen_flags: <defaults>
</compile_context>

<pallas_src>
import functools

import jax
import jax.numpy as jnp
from jax.experimental import pallas as pl
from jax.experimental.pallas import tpu as pltpu


_LN_EPS = 1e-5
_ROW_TILE = 256  # target token-row tile for the (M, D) kernels (multiple of 8)


# ---------------------------------------------------------------------------
# Exact (erf-based) GELU from basic arithmetic.  Rational float32 erf
# approximation (same form XLA uses for f32 erf); the denominator divide is
# routed through pl.reciprocal so it leaves the VALU slot.
# ---------------------------------------------------------------------------
_ERF_ALPHA = (0.00022905065861350646, 0.0034082910107109506,
              0.050955695062380861, 0.18520832239976145, 1.128379143519084)
_ERF_BETA = (-1.1791602954361697e-7, 0.000023547966471313185,
             0.0010179625278914885, 0.014070470171167667,
             0.11098505178285362, 0.49746925110067538, 1.0)


def _poly(x2, coeffs):
    r = jnp.full_like(x2, coeffs[0])
    for c in coeffs[1:]:
        r = r * x2 + c
    return r


def _gelu_exact(x):
    # 0.5 * x * (1 + erf(x / sqrt(2)))  == torch.nn.GELU() / F.gelu default
    xs = jnp.clip(x * 0.7071067811865475, -4.0, 4.0)
    x2 = xs * xs
    erf = xs * _poly(x2, _ERF_ALPHA) * pl.reciprocal(_poly(x2, _ERF_BETA),
                                                     approx=False)
    return 0.5 * x * (1.0 + erf)


def _layer_norm(y, g, b, eps=_LN_EPS):
    mean = jnp.mean(y, axis=-1, keepdims=True)
    yc = y - mean
    var = jnp.mean(yc * yc, axis=-1, keepdims=True)   # biased variance (PyTorch)
    return yc * jax.lax.rsqrt(var + eps) * g + b      # rsqrt -> EUP slot


def _row_tile(m):
    # full extent for small M (always legal); multiple-of-8 tile for large M
    return m if m <= _ROW_TILE else _ROW_TILE


# ---------------------------------------------------------------------------
# Kernel 1: fused self-attention block (QKV proj + MHA + out proj + residual
#           + LayerNorm1).  One grid step per batch element; all heads of a
#           batch handled inside the kernel via static lane slices of a VMEM
#           qkv scratch -- no external head-split transposes.
# ---------------------------------------------------------------------------
def _attn_block_kernel(x_ref, w_in_ref, b_in_ref, w_out_ref, b_out_ref,
                       ln_g_ref, ln_b_ref, o_ref, qkv_ref, heads_ref,
                       *, num_heads):
    x = x_ref[0]                                              # (S, D)
    d = x.shape[-1]
    hd = d // num_heads
    scale = 1.0 / float(hd) ** 0.5

    qkv_ref[...] = (jnp.dot(x, w_in_ref[...],
                            preferred_element_type=jnp.float32) + b_in_ref[...])

    for h in range(num_heads):                                # static unroll
        qh = qkv_ref[:, h * hd:(h + 1) * hd]                  # (S, hd)
        kh = qkv_ref[:, d + h * hd:d + (h + 1) * hd]
        vh = qkv_ref[:, 2 * d + h * hd:2 * d + (h + 1) * hd]
        s = jax.lax.dot_general(qh, kh, (((1,), (1,)), ((), ())),
                                preferred_element_type=jnp.float32) * scale
        s = s - jnp.max(s, axis=-1, keepdims=True)
        p = jnp.exp(s)
        p = p * pl.reciprocal(jnp.sum(p, axis=-1, keepdims=True), approx=True)
        heads_ref[:, h * hd:(h + 1) * hd] = jnp.dot(
            p, vh, preferred_element_type=jnp.float32)

    attn = (jnp.dot(heads_ref[...], w_out_ref[...],
                    preferred_element_type=jnp.float32) + b_out_ref[...])
    o_ref[0] = _layer_norm(x + attn, ln_g_ref[...], ln_b_ref[...])


def attention_block(x, p, num_heads):
    b, s, d = x.shape
    x_spec = pl.BlockSpec((1, s, d), lambda i: (i, 0, 0))
    full2 = lambda shp: pl.BlockSpec(shp, lambda i: (0, 0))
    return pl.pallas_call(
        functools.partial(_attn_block_kernel, num_heads=num_heads),
        grid=(b,),
        in_specs=[x_spec,
                  full2((d, 3 * d)), full2((1, 3 * d)),
                  full2((d, d)), full2((1, d)),
                  full2((1, d)), full2((1, d))],
        out_specs=x_spec,
        out_shape=jax.ShapeDtypeStruct((b, s, d), jnp.float32),
        scratch_shapes=[pltpu.VMEM((s, 3 * d), jnp.float32),
                        pltpu.VMEM((s, d), jnp.float32)],
        compiler_params=pltpu.CompilerParams(dimension_semantics=("parallel",)),
    )(x, p["w_in"], p["b_in"], p["w_out"], p["b_out"], p["ln1_g"], p["ln1_b"])


# ---------------------------------------------------------------------------
# Kernel 2: fused feed-forward block (ff1 + GELU + ff2 + residual + LayerNorm2),
#           tiled over token rows; weights stay resident across grid steps.
# ---------------------------------------------------------------------------
def _ffn_block_kernel(x_ref, w1_ref, b1_ref, w2_ref, b2_ref,
                      ln_g_ref, ln_b_ref, o_ref):
    x = x_ref[...]                                            # (tm, D)
    h = jnp.dot(x, w1_ref[...], preferred_element_type=jnp.float32) + b1_ref[...]
    h = _gelu_exact(h)
    f = jnp.dot(h, w2_ref[...], preferred_element_type=jnp.float32) + b2_ref[...]
    o_ref[...] = _layer_norm(x + f, ln_g_ref[...], ln_b_ref[...])


def ffn_block(x, p):
    m, d = x.shape
    ff = p["w_ff1"].shape[1]
    tm = _row_tile(m)
    row_spec = pl.BlockSpec((tm, d), lambda i: (i, 0))
    full2 = lambda shp: pl.BlockSpec(shp, lambda i: (0, 0))
    return pl.pallas_call(
        _ffn_block_kernel,
        grid=(pl.cdiv(m, tm),),
        in_specs=[row_spec,
                  full2((d, ff)), full2((1, ff)),
                  full2((ff, d)), full2((1, d)),
                  full2((1, d)), full2((1, d))],
        out_specs=row_spec,
        out_shape=jax.ShapeDtypeStruct((m, d), jnp.float32),
        compiler_params=pltpu.CompilerParams(dimension_semantics=("parallel",)),
    )(x, p["w_ff1"], p["b_ff1"], p["w_ff2"], p["b_ff2"], p["ln2_g"], p["ln2_b"])


# ---------------------------------------------------------------------------
# Kernel 3: fused DynMoE block (cosine gate + expert-0 MLP + combine) with the
#           trailing "x + moe_out" residual folded in.  Tiled over token rows.
# ---------------------------------------------------------------------------
def _moe_block_kernel(x_ref, wgn_ref, g_ref, w1_ref, b1_ref, w2_ref, b2_ref,
                      o_ref):
    x = x_ref[...]                                            # (tm, D)

    # F.normalize(x, p=2, dim=-1, eps=1e-12): x / max(||x||, 1e-12)
    ss = jnp.sum(x * x, axis=-1, keepdims=True)
    xn = x * jax.lax.rsqrt(jnp.maximum(ss, 1e-24))
    # cosine similarity with pre-normalized gate row (hoisted out of kernel)
    sim = jax.lax.dot_general(xn, wgn_ref[...], (((1,), (1,)), ((), ())),
                              preferred_element_type=jnp.float32)    # (tm, 1)
    # sigmoid(sim) > sigmoid(G)  <=>  sim > G   (sigmoid is monotone)
    gate = (sim > g_ref[...]).astype(jnp.float32)                    # (tm, 1)

    # Expert 0: Linear -> GELU -> Linear
    h = jnp.dot(x, w1_ref[...], preferred_element_type=jnp.float32) + b1_ref[...]
    h = _gelu_exact(h)
    eo = jnp.dot(h, w2_ref[...], preferred_element_type=jnp.float32) + b2_ref[...]

    k = gate                                  # sum over the single active expert
    scale = jnp.where(k > 0, 1.0 / (k + 1e-12), 1.0)   # matches PyTorch exactly
    out = (eo * gate) * scale
    # rows where no expert fired -> top-1 fallback (only expert 0 is active)
    out = jnp.where(k == 0, eo, out)
    o_ref[...] = x + out                       # fused trailing residual


def dynmoe_block(x, p):
    b, s, d = x.shape
    m = b * s
    x_flat = x.reshape(m, d)
    e = p["w1"].shape[1]
    tm = _row_tile(m)
    row_spec = pl.BlockSpec((tm, d), lambda i: (i, 0))
    full2 = lambda shp: pl.BlockSpec(shp, lambda i: (0, 0))
    out = pl.pallas_call(
        _moe_block_kernel,
        grid=(pl.cdiv(m, tm),),
        in_specs=[row_spec,
                  full2((1, d)), full2((1, 1)),
                  full2((d, e)), full2((1, e)),
                  full2((e, d)), full2((1, d))],
        out_specs=row_spec,
        out_shape=jax.ShapeDtypeStruct((m, d), jnp.float32),
        compiler_params=pltpu.CompilerParams(dimension_semantics=("parallel",)),
    )(x_flat, p["wgn"], p["g"], p["w1"], p["b1"], p["w2"], p["b2"])
    return out.reshape(b, s, d)


# ---------------------------------------------------------------------------
# Model glue
# ---------------------------------------------------------------------------
def transformer_encoder_layer(x, p, num_heads):
    # PyTorch default post-norm (norm_first=False), gelu activation, eval mode.
    b, s, d = x.shape
    x1 = attention_block(x, p, num_heads)              # attn + residual + LN1
    x2 = ffn_block(x1.reshape(b * s, d), p)            # FFN + residual + LN2
    return x2.reshape(b, s, d)


def transformer_with_dynmoe(tokens, params, num_heads):
    x = params["embedding"][tokens]                    # embedding gather (glue)
    for enc_p, moe_p in zip(params["enc_layers"], params["moe_layers"]):
        x = transformer_encoder_layer(x, enc_p, num_heads)
        x = dynmoe_block(x, moe_p)                     # residual fused in-kernel
    return x


# ---------------------------------------------------------------------------
# Deterministic parameter init (shapes follow the PyTorch module's __init__)
# ---------------------------------------------------------------------------
def init_params(key, num_layers, input_dim, expert_dim, max_experts, vocab=10000):
    ff = expert_dim * 2
    n_blocks = num_layers // 2
    keys = jax.random.split(key, 1 + 2 * n_blocks)
    params = {"embedding": jax.random.normal(keys[0], (vocab, input_dim),
                                             jnp.float32)}

    enc_layers, moe_layers = [], []
    for i in range(n_blocks):
        ke = jax.random.split(keys[1 + 2 * i], 4)
        enc_layers.append(dict(
            w_in=0.1 * jax.random.normal(ke[0], (input_dim, 3 * input_dim), jnp.float32),
            b_in=jnp.zeros((1, 3 * input_dim), jnp.float32),
            w_out=0.1 * jax.random.normal(ke[1], (input_dim, input_dim), jnp.float32),
            b_out=jnp.zeros((1, input_dim), jnp.float32),
            w_ff1=0.02 * jax.random.normal(ke[2], (input_dim, ff), jnp.float32),
            b_ff1=jnp.zeros((1, ff), jnp.float32),
            w_ff2=0.02 * jax.random.normal(ke[3], (ff, input_dim), jnp.float32),
            b_ff2=jnp.zeros((1, input_dim), jnp.float32),
            ln1_g=jnp.ones((1, input_dim), jnp.float32),
            ln1_b=jnp.zeros((1, input_dim), jnp.float32),
            ln2_g=jnp.ones((1, input_dim), jnp.float32),
            ln2_b=jnp.zeros((1, input_dim), jnp.float32),
        ))

        km = jax.random.split(keys[2 + 2 * i], 3)
        # Full DYNMOE parameter shapes; only expert 0 is active (module __init__).
        Wg = jax.random.normal(km[0], (max_experts, input_dim), jnp.float32)
        G = jnp.zeros((max_experts,), jnp.float32)
        W1 = 0.02 * jax.random.normal(km[1], (max_experts, expert_dim, input_dim),
                                      jnp.float32)
        W2 = 0.02 * jax.random.normal(km[2], (max_experts, input_dim, expert_dim),
                                      jnp.float32)
        active = 0
        wg_act = Wg[active:active + 1]                                   # (1, D)
        # hoisted F.normalize(Wg_active): it is a per-layer constant
        wgn = wg_act / jnp.maximum(
            jnp.sqrt(jnp.sum(wg_act * wg_act, axis=-1, keepdims=True)), 1e-12)
        moe_layers.append(dict(
            wgn=wgn,                                                     # (1, D)
            g=G[active:active + 1].reshape(1, 1),                        # (1, 1)
            w1=W1[active].T,                                             # (D, E)
            b1=jnp.zeros((1, expert_dim), jnp.float32),
            w2=W2[active].T,                                             # (E, D)
            b2=jnp.zeros((1, input_dim), jnp.float32),
        ))

    params["enc_layers"] = enc_layers
    params["moe_layers"] = moe_layers
    return params


# ---------------------------------------------------------------------------
if __name__ == "__main__":
    num_layers, input_dim, expert_dim, num_heads, max_experts = 2, 32, 32, 8, 16
    B, S = 2, 8

    key = jax.random.PRNGKey(0)
    pkey, tkey = jax.random.split(key)
    params = init_params(pkey, num_layers, input_dim, expert_dim, max_experts)
    tokens = jax.random.randint(tkey, (B, S), 0, 10000, dtype=jnp.int32)

    fwd = jax.jit(functools.partial(transformer_with_dynmoe, num_heads=num_heads))
    out = fwd(tokens, params)
    jax.block_until_ready(out)

    assert out.shape == (B, S, input_dim)
    assert bool(jnp.all(jnp.isfinite(out)))
    print("KERNEL_OK")
</pallas_src>

<mosaic_0001>
module attributes {stable_mosaic.version = 11 : i64} {
  func.func @_ffn_block_kernel(%arg0: i32, %arg1: memref<16x32xf32, #tpu.memory_space<vmem>>, %arg2: memref<32x64xf32, #tpu.memory_space<vmem>>, %arg3: memref<1x64xf32, #tpu.memory_space<vmem>>, %arg4: memref<64x32xf32, #tpu.memory_space<vmem>>, %arg5: memref<1x32xf32, #tpu.memory_space<vmem>>, %arg6: memref<1x32xf32, #tpu.memory_space<vmem>>, %arg7: memref<1x32xf32, #tpu.memory_space<vmem>>, %arg8: memref<16x32xf32, #tpu.memory_space<vmem>>) attributes {dimension_semantics = [#tpu.dimension_semantics<parallel>], iteration_bounds = array<i64: 1>, scalar_prefetch = 0 : i64, scratch_operands = 0 : i64, tpu.core_type = #tpu.core_type<tc>, window_params = [{transform_indices = @transform_0, window_bounds = array<i64: 16, 32>}, {pipeline_mode = #tpu.pipeline_mode<synchronous>, transform_indices = @transform_1, window_bounds = array<i64: 32, 64>}, {pipeline_mode = #tpu.pipeline_mode<synchronous>, transform_indices = @transform_2, window_bounds = array<i64: 1, 64>}, {pipeline_mode = #tpu.pipeline_mode<synchronous>, transform_indices = @transform_3, window_bounds = array<i64: 64, 32>}, {pipeline_mode = #tpu.pipeline_mode<synchronous>, transform_indices = @transform_4, window_bounds = array<i64: 1, 32>}, {pipeline_mode = #tpu.pipeline_mode<synchronous>, transform_indices = @transform_5, window_bounds = array<i64: 1, 32>}, {pipeline_mode = #tpu.pipeline_mode<synchronous>, transform_indices = @transform_6, window_bounds = array<i64: 1, 32>}, {transform_indices = @transform_7, window_bounds = array<i64: 16, 32>}]} {
    %c0 = arith.constant 0 : index
    %c0_0 = arith.constant 0 : index
    %0 = vector.load %arg1[%c0, %c0_0] : memref<16x32xf32, #tpu.memory_space<vmem>>, vector<16x32xf32>
    %c0_1 = arith.constant 0 : index
    %c0_2 = arith.constant 0 : index
    %1 = vector.load %arg2[%c0_1, %c0_2] : memref<32x64xf32, #tpu.memory_space<vmem>>, vector<32x64xf32>
    %cst = arith.constant dense<0.000000e+00> : vector<16x64xf32>
    %2 = tpu.matmul %0, %1, %cst {dimension_numbers = #tpu.dot_dimension_numbers<[1], [0], [0], [1], [0, 0, 1, 1], [], []>} : vector<16x32xf32>, vector<32x64xf32>, vector<16x64xf32> -> vector<16x64xf32>
    %c0_3 = arith.constant 0 : index
    %c0_4 = arith.constant 0 : index
    %3 = vector.load %arg3[%c0_3, %c0_4] : memref<1x64xf32, #tpu.memory_space<vmem>>, vector<1x64xf32>
    %4 = vector.broadcast %3 : vector<1x64xf32> to vector<16x64xf32>
    %5 = arith.addf %2, %4 : vector<16x64xf32>
    %cst_5 = arith.constant 0.707106769 : f32
    %6 = vector.broadcast %cst_5 : f32 to vector<16x64xf32>
    %7 = arith.mulf %5, %6 : vector<16x64xf32>
    %cst_6 = arith.constant -4.000000e+00 : f32
    %cst_7 = arith.constant 4.000000e+00 : f32
    %8 = vector.broadcast %cst_6 : f32 to vector<16x64xf32>
    %9 = arith.maximumf %8, %7 : vector<16x64xf32>
    %10 = vector.broadcast %cst_7 : f32 to vector<16x64xf32>
    %11 = arith.minimumf %10, %9 : vector<16x64xf32>
    %12 = arith.mulf %11, %11 : vector<16x64xf32>
    %cst_8 = arith.constant 2.29050653E-4 : f32
    %13 = vector.broadcast %cst_8 : f32 to vector<16x64xf32>
    %14 = arith.mulf %13, %12 : vector<16x64xf32>
    %cst_9 = arith.constant 0.00340829091 : f32
    %15 = vector.broadcast %cst_9 : f32 to vector<16x64xf32>
    %16 = arith.addf %14, %15 : vector<16x64xf32>
    %17 = arith.mulf %16, %12 : vector<16x64xf32>
    %cst_10 = arith.constant 0.0509556942 : f32
    %18 = vector.broadcast %cst_10 : f32 to vector<16x64xf32>
    %19 = arith.addf %17, %18 : vector<16x64xf32>
    %20 = arith.mulf %19, %12 : vector<16x64xf32>
    %cst_11 = arith.constant 0.185208321 : f32
    %21 = vector.broadcast %cst_11 : f32 to vector<16x64xf32>
    %22 = arith.addf %20, %21 : vector<16x64xf32>
    %23 = arith.mulf %22, %12 : vector<16x64xf32>
    %cst_12 = arith.constant 1.12837911 : f32
    %24 = vector.broadcast %cst_12 : f32 to vector<16x64xf32>
    %25 = arith.addf %23, %24 : vector<16x64xf32>
    %26 = arith.mulf %11, %25 : vector<16x64xf32>
    %cst_13 = arith.constant -1.17916031E-7 : f32
    %27 = vector.broadcast %cst_13 : f32 to vector<16x64xf32>
    %28 = arith.mulf %27, %12 : vector<16x64xf32>
    %cst_14 = arith.constant 2.35479656E-5 : f32
    %29 = vector.broadcast %cst_14 : f32 to vector<16x64xf32>
    %30 = arith.addf %28, %29 : vector<16x64xf32>
    %31 = arith.mulf %30, %12 : vector<16x64xf32>
    %cst_15 = arith.constant 0.00101796258 : f32
    %32 = vector.broadcast %cst_15 : f32 to vector<16x64xf32>
    %33 = arith.addf %31, %32 : vector<16x64xf32>
    %34 = arith.mulf %33, %12 : vector<16x64xf32>
    %cst_16 = arith.constant 0.0140704699 : f32
    %35 = vector.broadcast %cst_16 : f32 to vector<16x64xf32>
    %36 = arith.addf %34, %35 : vector<16x64xf32>
    %37 = arith.mulf %36, %12 : vector<16x64xf32>
    %cst_17 = arith.constant 0.110985048 : f32
    %38 = vector.broadcast %cst_17 : f32 to vector<16x64xf32>
    %39 = arith.addf %37, %38 : vector<16x64xf32>
    %40 = arith.mulf %39, %12 : vector<16x64xf32>
    %cst_18 = arith.constant 0.497469246 : f32
    %41 = vector.broadcast %cst_18 : f32 to vector<16x64xf32>
    %42 = arith.addf %40, %41 : vector<16x64xf32>
    %43 = arith.mulf %42, %12 : vector<16x64xf32>
    %cst_19 = arith.constant 1.000000e+00 : f32
    %44 = vector.broadcast %cst_19 : f32 to vector<16x64xf32>
    %45 = arith.addf %43, %44 : vector<16x64xf32>
    %46 = tpu.reciprocal %45 : vector<16x64xf32> -> vector<16x64xf32>
    %47 = arith.mulf %26, %46 : vector<16x64xf32>
    %cst_20 = arith.constant 5.000000e-01 : f32
    %48 = vector.broadcast %cst_20 : f32 to vector<16x64xf32>
    %49 = arith.mulf %48, %5 : vector<16x64xf32>
    %cst_21 = arith.constant 1.000000e+00 : f32
    %50 = vector.broadcast %cst_21 : f32 to vector<16x64xf32>
    %51 = arith.addf %50, %47 : vector<16x64xf32>
    %52 = arith.mulf %49, %51 : vector<16x64xf32>
    %c0_22 = arith.constant 0 : index
    %c0_23 = arith.constant 0 : index
    %53 = vector.load %arg4[%c0_22, %c0_23] : memref<64x32xf32, #tpu.memory_space<vmem>>, vector<64x32xf32>
    %cst_24 = arith.constant dense<0.000000e+00> : vector<16x32xf32>
    %54 = tpu.matmul %52, %53, %cst_24 {dimension_numbers = #tpu.dot_dimension_numbers<[1], [0], [0], [1], [0, 0, 1, 1], [], []>} : vector<16x64xf32>, vector<64x32xf32>, vector<16x32xf32> -> vector<16x32xf32>
    %c0_25 = arith.constant 0 : index
    %c0_26 = arith.constant 0 : index
    %55 = vector.load %arg5[%c0_25, %c0_26] : memref<1x32xf32, #tpu.memory_space<vmem>>, vector<1x32xf32>
    %56 = vector.broadcast %55 : vector<1x32xf32> to vector<16x32xf32>
    %57 = arith.addf %54, %56 : vector<16x32xf32>
    %58 = arith.addf %0, %57 : vector<16x32xf32>
    %c0_27 = arith.constant 0 : index
    %c0_28 = arith.constant 0 : index
    %59 = vector.load %arg6[%c0_27, %c0_28] : memref<1x32xf32, #tpu.memory_space<vmem>>, vector<1x32xf32>
    %c0_29 = arith.constant 0 : index
    %c0_30 = arith.constant 0 : index
    %60 = vector.load %arg7[%c0_29, %c0_30] : memref<1x32xf32, #tpu.memory_space<vmem>>, vector<1x32xf32>
    %cst_31 = arith.constant dense<0.000000e+00> : vector<16xf32>
    %61 = vector.multi_reduction <add>, %58, %cst_31 [1] : vector<16x32xf32> to vector<16xf32>
    %62 = vector.shape_cast %61 : vector<16xf32> to vector<16x1xf32>
    %cst_32 = arith.constant 3.200000e+01 : f32
    %63 = vector.broadcast %cst_32 : f32 to vector<16x1xf32>
    %64 = arith.divf %62, %63 : vector<16x1xf32>
    %65 = vector.broadcast %64 : vector<16x1xf32> to vector<16x32xf32>
    %66 = arith.subf %58, %65 : vector<16x32xf32>
    %67 = arith.mulf %66, %66 : vector<16x32xf32>
    %cst_33 = arith.constant dense<0.000000e+00> : vector<16xf32>
    %68 = vector.multi_reduction <add>, %67, %cst_33 [1] : vector<16x32xf32> to vector<16xf32>
    %69 = vector.shape_cast %68 : vector<16xf32> to vector<16x1xf32>
    %cst_34 = arith.constant 3.200000e+01 : f32
    %70 = vector.broadcast %cst_34 : f32 to vector<16x1xf32>
    %71 = arith.divf %69, %70 : vector<16x1xf32>
    %cst_35 = arith.constant 9.99999974E-6 : f32
    %72 = vector.broadcast %cst_35 : f32 to vector<16x1xf32>
    %73 = arith.addf %71, %72 : vector<16x1xf32>
    %74 = math.rsqrt %73 : vector<16x1xf32>
    %75 = vector.broadcast %74 : vector<16x1xf32> to vector<16x32xf32>
    %76 = arith.mulf %66, %75 : vector<16x32xf32>
    %77 = vector.broadcast %59 : vector<1x32xf32> to vector<16x32xf32>
    %78 = arith.mulf %76, %77 : vector<16x32xf32>
    %79 = vector.broadcast %60 : vector<1x32xf32> to vector<16x32xf32>
    %80 = arith.addf %78, %79 : vector<16x32xf32>
    %c0_36 = arith.constant 0 : index
    %c0_37 = arith.constant 0 : index
    %81 = vector.load %arg8[%c0_36, %c0_37] : memref<16x32xf32, #tpu.memory_space<vmem>>, vector<16x32xf32>
    tpu.vector_store %arg8[%c0_36, %c0_37], %80 {strides = array<i32>} : memref<16x32xf32, #tpu.memory_space<vmem>>, vector<16x32xf32>,
    return
  }
  func.func @transform_0(%arg0: i32) -> (i32, i32) {
    %c0_i32 = arith.constant 0 : i32
    %c0_i32_0 = arith.constant 0 : i32
    return %arg0, %c0_i32 : i32, i32
  }
  func.func @transform_1(%arg0: i32) -> (i32, i32) {
    %c0_i32 = arith.constant 0 : i32
    %c0_i32_0 = arith.constant 0 : i32
    %c0_i32_1 = arith.constant 0 : i32
    return %c0_i32, %c0_i32_0 : i32, i32
  }
  func.func @transform_2(%arg0: i32) -> (i32, i32) {
    %c0_i32 = arith.constant 0 : i32
    %c0_i32_0 = arith.constant 0 : i32
    %c0_i32_1 = arith.constant 0 : i32
    return %c0_i32, %c0_i32_0 : i32, i32
  }
  func.func @transform_3(%arg0: i32) -> (i32, i32) {
    %c0_i32 = arith.constant 0 : i32
    %c0_i32_0 = arith.constant 0 : i32
    %c0_i32_1 = arith.constant 0 : i32
    return %c0_i32, %c0_i32_0 : i32, i32
  }
  func.func @transform_4(%arg0: i32) -> (i32, i32) {
    %c0_i32 = arith.constant 0 : i32
    %c0_i32_0 = arith.constant 0 : i32
    %c0_i32_1 = arith.constant 0 : i32
    return %c0_i32, %c0_i32_0 : i32, i32
  }
  func.func @transform_5(%arg0: i32) -> (i32, i32) {
    %c0_i32 = arith.constant 0 : i32
    %c0_i32_0 = arith.constant 0 : i32
    %c0_i32_1 = arith.constant 0 : i32
    return %c0_i32, %c0_i32_0 : i32, i32
  }
  func.func @transform_6(%arg0: i32) -> (i32, i32) {
    %c0_i32 = arith.constant 0 : i32
    %c0_i32_0 = arith.constant 0 : i32
    %c0_i32_1 = arith.constant 0 : i32
    return %c0_i32, %c0_i32_0 : i32, i32
  }
  func.func @transform_7(%arg0: i32) -> (i32, i32) {
    %c0_i32 = arith.constant 0 : i32
    %c0_i32_0 = arith.constant 0 : i32
    return %arg0, %c0_i32 : i32, i32
  }
}

module attributes {stable_mosaic.version = 11 : i64} {
  func.func @_moe_block_kernel(%arg0: i32, %arg1: memref<16x32xf32, #tpu.memory_space<vmem>>, %arg2: memref<1x32xf32, #tpu.memory_space<vmem>>, %arg3: memref<1x1xf32, #tpu.memory_space<vmem>>, %arg4: memref<32x32xf32, #tpu.memory_space<vmem>>, %arg5: memref<1x32xf32, #tpu.memory_space<vmem>>, %arg6: memref<32x32xf32, #tpu.memory_space<vmem>>, %arg7: memref<1x32xf32, #tpu.memory_space<vmem>>, %arg8: memref<16x32xf32, #tpu.memory_space<vmem>>) attributes {dimension_semantics = [#tpu.dimension_semantics<parallel>], iteration_bounds = array<i64: 1>, scalar_prefetch = 0 : i64, scratch_operands = 0 : i64, tpu.core_type = #tpu.core_type<tc>, window_params = [{transform_indices = @transform_0, window_bounds = array<i64: 16, 32>}, {pipeline_mode = #tpu.pipeline_mode<synchronous>, transform_indices = @transform_1, window_bounds = array<i64: 1, 32>}, {pipeline_mode = #tpu.pipeline_mode<synchronous>, transform_indices = @transform_2, window_bounds = array<i64: 1, 1>}, {pipeline_mode = #tpu.pipeline_mode<synchronous>, transform_indices = @transform_3, window_bounds = array<i64: 32, 32>}, {pipeline_mode = #tpu.pipeline_mode<synchronous>, transform_indices = @transform_4, window_bounds = array<i64: 1, 32>}, {pipeline_mode = #tpu.pipeline_mode<synchronous>, transform_indices = @transform_5, window_bounds = array<i64: 32, 32>}, {pipeline_mode = #tpu.pipeline_mode<synchronous>, transform_indices = @transform_6, window_bounds = array<i64: 1, 32>}, {transform_indices = @transform_7, window_bounds = array<i64: 16, 32>}]} {
    %c0 = arith.constant 0 : index
    %c0_0 = arith.constant 0 : index
    %0 = vector.load %arg1[%c0, %c0_0] : memref<16x32xf32, #tpu.memory_space<vmem>>, vector<16x32xf32>
    %1 = arith.mulf %0, %0 : vector<16x32xf32>
    %cst = arith.constant dense<0.000000e+00> : vector<16xf32>
    %2 = vector.multi_reduction <add>, %1, %cst [1] : vector<16x32xf32> to vector<16xf32>
    %3 = vector.shape_cast %2 : vector<16xf32> to vector<16x1xf32>
    %cst_1 = arith.constant 1.000000e-24 : f32
    %4 = vector.broadcast %cst_1 : f32 to vector<16x1xf32>
    %5 = arith.maximumf %3, %4 : vector<16x1xf32>
    %6 = math.rsqrt %5 : vector<16x1xf32>
    %7 = vector.broadcast %6 : vector<16x1xf32> to vector<16x32xf32>
    %8 = arith.mulf %0, %7 : vector<16x32xf32>
    %c0_2 = arith.constant 0 : index
    %c0_3 = arith.constant 0 : index
    %9 = vector.load %arg2[%c0_2, %c0_3] : memref<1x32xf32, #tpu.memory_space<vmem>>, vector<1x32xf32>
    %cst_4 = arith.constant dense<0.000000e+00> : vector<16x1xf32>
    %10 = tpu.matmul %8, %9, %cst_4 {dimension_numbers = #tpu.dot_dimension_numbers<[1], [1], [0], [0], [0, 0, 1, 0], [], []>} : vector<16x32xf32>, vector<1x32xf32>, vector<16x1xf32> -> vector<16x1xf32>
    %c0_5 = arith.constant 0 : index
    %c0_6 = arith.constant 0 : index
    %11 = vector.load %arg3[%c0_5, %c0_6] : memref<1x1xf32, #tpu.memory_space<vmem>>, vector<1x1xf32>
    %12 = vector.broadcast %11 : vector<1x1xf32> to vector<16x1xf32>
    %13 = arith.cmpf ogt, %10, %12 : vector<16x1xf32>
    %14 = arith.extui %13 : vector<16x1xi1> to vector<16x1xi32>
    %15 = arith.sitofp %14 : vector<16x1xi32> to vector<16x1xf32>
    %c0_7 = arith.constant 0 : index
    %c0_8 = arith.constant 0 : index
    %16 = vector.load %arg4[%c0_7, %c0_8] : memref<32x32xf32, #tpu.memory_space<vmem>>, vector<32x32xf32>
    %cst_9 = arith.constant dense<0.000000e+00> : vector<16x32xf32>
    %17 = tpu.matmul %0, %16, %cst_9 {dimension_numbers = #tpu.dot_dimension_numbers<[1], [0], [0], [1], [0, 0, 1, 1], [], []>} : vector<16x32xf32>, vector<32x32xf32>, vector<16x32xf32> -> vector<16x32xf32>
    %c0_10 = arith.constant 0 : index
    %c0_11 = arith.constant 0 : index
    %18 = vector.load %arg5[%c0_10, %c0_11] : memref<1x32xf32, #tpu.memory_space<vmem>>, vector<1x32xf32>
    %19 = vector.broadcast %18 : vector<1x32xf32> to vector<16x32xf32>
    %20 = arith.addf %17, %19 : vector<16x32xf32>
    %cst_12 = arith.constant 0.707106769 : f32
    %21 = vector.broadcast %cst_12 : f32 to vector<16x32xf32>
    %22 = arith.mulf %20, %21 : vector<16x32xf32>
    %cst_13 = arith.constant -4.000000e+00 : f32
    %cst_14 = arith.constant 4.000000e+00 : f32
    %23 = vector.broadcast %cst_13 : f32 to vector<16x32xf32>
    %24 = arith.maximumf %23, %22 : vector<16x32xf32>
    %25 = vector.broadcast %cst_14 : f32 to vector<16x32xf32>
    %26 = arith.minimumf %25, %24 : vector<16x32xf32>
    %27 = arith.mulf %26, %26 : vector<16x32xf32>
    %cst_15 = arith.constant 2.29050653E-4 : f32
    %28 = vector.broadcast %cst_15 : f32 to vector<16x32xf32>
    %29 = arith.mulf %28, %27 : vector<16x32xf32>
    %cst_16 = arith.constant 0.00340829091 : f32
    %30 = vector.broadcast %cst_16 : f32 to vector<16x32xf32>
    %31 = arith.addf %29, %30 : vector<16x32xf32>
    %32 = arith.mulf %31, %27 : vector<16x32xf32>
    %cst_17 = arith.constant 0.0509556942 : f32
    %33 = vector.broadcast %cst_17 : f32 to vector<16x32xf32>
    %34 = arith.addf %32, %33 : vector<16x32xf32>
    %35 = arith.mulf %34, %27 : vector<16x32xf32>
    %cst_18 = arith.constant 0.185208321 : f32
    %36 = vector.broadcast %cst_18 : f32 to vector<16x32xf32>
    %37 = arith.addf %35, %36 : vector<16x32xf32>
    %38 = arith.mulf %37, %27 : vector<16x32xf32>
    %cst_19 = arith.constant 1.12837911 : f32
    %39 = vector.broadcast %cst_19 : f32 to vector<16x32xf32>
    %40 = arith.addf %38, %39 : vector<16x32xf32>
    %41 = arith.mulf %26, %40 : vector<16x32xf32>
    %cst_20 = arith.constant -1.17916031E-7 : f32
    %42 = vector.broadcast %cst_20 : f32 to vector<16x32xf32>
    %43 = arith.mulf %42, %27 : vector<16x32xf32>
    %cst_21 = arith.constant 2.35479656E-5 : f32
    %44 = vector.broadcast %cst_21 : f32 to vector<16x32xf32>
    %45 = arith.addf %43, %44 : vector<16x32xf32>
    %46 = arith.mulf %45, %27 : vector<16x32xf32>
    %cst_22 = arith.constant 0.00101796258 : f32
    %47 = vector.broadcast %cst_22 : f32 to vector<16x32xf32>
    %48 = arith.addf %46, %47 : vector<16x32xf32>
    %49 = arith.mulf %48, %27 : vector<16x32xf32>
    %cst_23 = arith.constant 0.0140704699 : f32
    %50 = vector.broadcast %cst_23 : f32 to vector<16x32xf32>
    %51 = arith.addf %49, %50 : vector<16x32xf32>
    %52 = arith.mulf %51, %27 : vector<16x32xf32>
    %cst_24 = arith.constant 0.110985048 : f32
    %53 = vector.broadcast %cst_24 : f32 to vector<16x32xf32>
    %54 = arith.addf %52, %53 : vector<16x32xf32>
    %55 = arith.mulf %54, %27 : vector<16x32xf32>
    %cst_25 = arith.constant 0.497469246 : f32
    %56 = vector.broadcast %cst_25 : f32 to vector<16x32xf32>
    %57 = arith.addf %55, %56 : vector<16x32xf32>
    %58 = arith.mulf %57, %27 : vector<16x32xf32>
    %cst_26 = arith.constant 1.000000e+00 : f32
    %59 = vector.broadcast %cst_26 : f32 to vector<16x32xf32>
    %60 = arith.addf %58, %59 : vector<16x32xf32>
    %61 = tpu.reciprocal %60 : vector<16x32xf32> -> vector<16x32xf32>
    %62 = arith.mulf %41, %61 : vector<16x32xf32>
    %cst_27 = arith.constant 5.000000e-01 : f32
    %63 = vector.broadcast %cst_27 : f32 to vector<16x32xf32>
    %64 = arith.mulf %63, %20 : vector<16x32xf32>
    %cst_28 = arith.constant 1.000000e+00 : f32
    %65 = vector.broadcast %cst_28 : f32 to vector<16x32xf32>
    %66 = arith.addf %65, %62 : vector<16x32xf32>
    %67 = arith.mulf %64, %66 : vector<16x32xf32>
    %c0_29 = arith.constant 0 : index
    %c0_30 = arith.constant 0 : index
    %68 = vector.load %arg6[%c0_29, %c0_30] : memref<32x32xf32, #tpu.memory_space<vmem>>, vector<32x32xf32>
    %cst_31 = arith.constant dense<0.000000e+00> : vector<16x32xf32>
    %69 = tpu.matmul %67, %68, %cst_31 {dimension_numbers = #tpu.dot_dimension_numbers<[1], [0], [0], [1], [0, 0, 1, 1], [], []>} : vector<16x32xf32>, vector<32x32xf32>, vector<16x32xf32> -> vector<16x32xf32>
    %c0_32 = arith.constant 0 : index
    %c0_33 = arith.constant 0 : index
    %70 = vector.load %arg7[%c0_32, %c0_33] : memref<1x32xf32, #tpu.memory_space<vmem>>, vector<1x32xf32>
    %71 = vector.broadcast %70 : vector<1x32xf32> to vector<16x32xf32>
    %72 = arith.addf %69, %71 : vector<16x32xf32>
    %cst_34 = arith.constant 0.000000e+00 : f32
    %73 = vector.broadcast %cst_34 : f32 to vector<16x1xf32>
    %74 = arith.cmpf ogt, %15, %73 : vector<16x1xf32>
    %cst_35 = arith.constant 9.99999996E-13 : f32
    %75 = vector.broadcast %cst_35 : f32 to vector<16x1xf32>
    %76 = arith.addf %15, %75 : vector<16x1xf32>
    %cst_36 = arith.constant 1.000000e+00 : f32
    %77 = vector.broadcast %cst_36 : f32 to vector<16x1xf32>
    %78 = arith.divf %77, %76 : vector<16x1xf32>
    %cst_37 = arith.constant 1.000000e+00 : f32
    %79 = vector.broadcast %cst_37 : f32 to vector<16x1xf32>
    %80 = arith.select %74, %78, %79 : vector<16x1xi1>, vector<16x1xf32>
    %81 = vector.broadcast %15 : vector<16x1xf32> to vector<16x32xf32>
    %82 = arith.mulf %72, %81 : vector<16x32xf32>
    %83 = vector.broadcast %80 : vector<16x1xf32> to vector<16x32xf32>
    %84 = arith.mulf %82, %83 : vector<16x32xf32>
    %cst_38 = arith.constant 0.000000e+00 : f32
    %85 = vector.broadcast %cst_38 : f32 to vector<16x1xf32>
    %86 = arith.cmpf oeq, %15, %85 : vector<16x1xf32>
    %87 = vector.shape_cast %86 : vector<16x1xi1> to vector<16x1xi1>
    %88 = vector.broadcast %87 : vector<16x1xi1> to vector<16x32xi1>
    %89 = arith.select %88, %72, %84 : vector<16x32xi1>, vector<16x32xf32>
    %90 = arith.addf %0, %89 : vector<16x32xf32>
    %c0_39 = arith.constant 0 : index
    %c0_40 = arith.constant 0 : index
    %91 = vector.load %arg8[%c0_39, %c0_40] : memref<16x32xf32, #tpu.memory_space<vmem>>, vector<16x32xf32>
    tpu.vector_store %arg8[%c0_39, %c0_40], %90 {strides = array<i32>} : memref<16x32xf32, #tpu.memory_space<vmem>>, vector<16x32xf32>,
    return
  }
  func.func @transform_0(%arg0: i32) -> (i32, i32) {
    %c0_i32 = arith.constant 0 : i32
    %c0_i32_0 = arith.constant 0 : i32
    return %arg0, %c0_i32 : i32, i32
  }
  func.func @transform_1(%arg0: i32) -> (i32, i32) {
    %c0_i32 = arith.constant 0 : i32
    %c0_i32_0 = arith.constant 0 : i32
    %c0_i32_1 = arith.constant 0 : i32
    return %c0_i32, %c0_i32_0 : i32, i32
  }
  func.func @transform_2(%arg0: i32) -> (i32, i32) {
    %c0_i32 = arith.constant 0 : i32
    %c0_i32_0 = arith.constant 0 : i32
    %c0_i32_1 = arith.constant 0 : i32
    return %c0_i32, %c0_i32_0 : i32, i32
  }
  func.func @transform_3(%arg0: i32) -> (i32, i32) {
    %c0_i32 = arith.constant 0 : i32
    %c0_i32_0 = arith.constant 0 : i32
    %c0_i32_1 = arith.constant 0 : i32
    return %c0_i32, %c0_i32_0 : i32, i32
  }
  func.func @transform_4(%arg0: i32) -> (i32, i32) {
    %c0_i32 = arith.constant 0 : i32
    %c0_i32_0 = arith.constant 0 : i32
    %c0_i32_1 = arith.constant 0 : i32
    return %c0_i32, %c0_i32_0 : i32, i32
  }
  func.func @transform_5(%arg0: i32) -> (i32, i32) {
    %c0_i32 = arith.constant 0 : i32
    %c0_i32_0 = arith.constant 0 : i32
    %c0_i32_1 = arith.constant 0 : i32
    return %c0_i32, %c0_i32_0 : i32, i32
  }
  func.func @transform_6(%arg0: i32) -> (i32, i32) {
    %c0_i32 = arith.constant 0 : i32
    %c0_i32_0 = arith.constant 0 : i32
    %c0_i32_1 = arith.constant 0 : i32
    return %c0_i32, %c0_i32_0 : i32, i32
  }
  func.func @transform_7(%arg0: i32) -> (i32, i32) {
    %c0_i32 = arith.constant 0 : i32
    %c0_i32_0 = arith.constant 0 : i32
    return %arg0, %c0_i32 : i32, i32
  }
}

module attributes {stable_mosaic.version = 11 : i64} {
  func.func @_attn_block_kernel(%arg0: i32, %arg1: memref<1x8x32xf32, #tpu.memory_space<vmem>>, %arg2: memref<32x96xf32, #tpu.memory_space<vmem>>, %arg3: memref<1x96xf32, #tpu.memory_space<vmem>>, %arg4: memref<32x32xf32, #tpu.memory_space<vmem>>, %arg5: memref<1x32xf32, #tpu.memory_space<vmem>>, %arg6: memref<1x32xf32, #tpu.memory_space<vmem>>, %arg7: memref<1x32xf32, #tpu.memory_space<vmem>>, %arg8: memref<1x8x32xf32, #tpu.memory_space<vmem>>, %arg9: memref<8x96xf32, #tpu.memory_space<vmem>>, %arg10: memref<8x32xf32, #tpu.memory_space<vmem>>) attributes {dimension_semantics = [#tpu.dimension_semantics<parallel>], iteration_bounds = array<i64: 2>, scalar_prefetch = 0 : i64, scratch_operands = 2 : i64, tpu.core_type = #tpu.core_type<tc>, window_params = [{transform_indices = @transform_0, window_bounds = array<i64: 1, 8, 32>}, {pipeline_mode = #tpu.pipeline_mode<synchronous>, transform_indices = @transform_1, window_bounds = array<i64: 32, 96>}, {pipeline_mode = #tpu.pipeline_mode<synchronous>, transform_indices = @transform_2, window_bounds = array<i64: 1, 96>}, {pipeline_mode = #tpu.pipeline_mode<synchronous>, transform_indices = @transform_3, window_bounds = array<i64: 32, 32>}, {pipeline_mode = #tpu.pipeline_mode<synchronous>, transform_indices = @transform_4, window_bounds = array<i64: 1, 32>}, {pipeline_mode = #tpu.pipeline_mode<synchronous>, transform_indices = @transform_5, window_bounds = array<i64: 1, 32>}, {pipeline_mode = #tpu.pipeline_mode<synchronous>, transform_indices = @transform_6, window_bounds = array<i64: 1, 32>}, {transform_indices = @transform_7, window_bounds = array<i64: 1, 8, 32>}]} {
    %c0 = arith.constant 0 : index
    %c0_0 = arith.constant 0 : index
    %c0_1 = arith.constant 0 : index
    %0 = vector.load %arg1[%c0, %c0_0, %c0_1] : memref<1x8x32xf32, #tpu.memory_space<vmem>>, vector<1x8x32xf32>
    %1 = vector.shape_cast %0 : vector<1x8x32xf32> to vector<8x32xf32>
    %c0_2 = arith.constant 0 : index
    %c0_3 = arith.constant 0 : index
    %2 = vector.load %arg2[%c0_2, %c0_3] : memref<32x96xf32, #tpu.memory_space<vmem>>, vector<32x96xf32>
    %cst = arith.constant dense<0.000000e+00> : vector<8x96xf32>
    %3 = tpu.matmul %1, %2, %cst {dimension_numbers = #tpu.dot_dimension_numbers<[1], [0], [0], [1], [0, 0, 1, 1], [], []>} : vector<8x32xf32>, vector<32x96xf32>, vector<8x96xf32> -> vector<8x96xf32>
    %c0_4 = arith.constant 0 : index
    %c0_5 = arith.constant 0 : index
    %4 = vector.load %arg3[%c0_4, %c0_5] : memref<1x96xf32, #tpu.memory_space<vmem>>, vector<1x96xf32>
    %5 = vector.broadcast %4 : vector<1x96xf32> to vector<8x96xf32>
    %6 = arith.addf %3, %5 : vector<8x96xf32>
    %c0_6 = arith.constant 0 : index
    %c0_7 = arith.constant 0 : index
    %7 = vector.load %arg9[%c0_6, %c0_7] : memref<8x96xf32, #tpu.memory_space<vmem>>, vector<8x96xf32>
    tpu.vector_store %arg9[%c0_6, %c0_7], %6 {strides = array<i32>} : memref<8x96xf32, #tpu.memory_space<vmem>>, vector<8x96xf32>,
    %c0_8 = arith.constant 0 : index
    %c0_9 = arith.constant 0 : index
    %8 = vector.load %arg9[%c0_8, %c0_9] : memref<8x96xf32, #tpu.memory_space<vmem>>, vector<8x4xf32>
    %c0_10 = arith.constant 0 : index
    %c32 = arith.constant 32 : index
    %9 = vector.load %arg9[%c0_10, %c32] : memref<8x96xf32, #tpu.memory_space<vmem>>, vector<8x4xf32>
    %c0_11 = arith.constant 0 : index
    %c64 = arith.constant 64 : index
    %10 = vector.load %arg9[%c0_11, %c64] : memref<8x96xf32, #tpu.memory_space<vmem>>, vector<8x4xf32>
    %cst_12 = arith.constant dense<0.000000e+00> : vector<8x8xf32>
    %11 = tpu.matmul %8, %9, %cst_12 {dimension_numbers = #tpu.dot_dimension_numbers<[1], [1], [0], [0], [0, 0, 1, 0], [], []>} : vector<8x4xf32>, vector<8x4xf32>, vector<8x8xf32> -> vector<8x8xf32>
    %cst_13 = arith.constant 5.000000e-01 : f32
    %12 = vector.broadcast %cst_13 : f32 to vector<8x8xf32>
    %13 = arith.mulf %11, %12 : vector<8x8xf32>
    %cst_14 = arith.constant dense<0xFF800000> : vector<8xf32>
    %14 = vector.multi_reduction <maximumf>, %13, %cst_14 [1] : vector<8x8xf32> to vector<8xf32>
    %15 = vector.shape_cast %14 : vector<8xf32> to vector<8x1xf32>
    %16 = vector.broadcast %15 : vector<8x1xf32> to vector<8x8xf32>
    %17 = arith.subf %13, %16 : vector<8x8xf32>
    %18 = math.exp %17 : vector<8x8xf32>
    %cst_15 = arith.constant dense<0.000000e+00> : vector<8xf32>
    %19 = vector.multi_reduction <add>, %18, %cst_15 [1] : vector<8x8xf32> to vector<8xf32>
    %20 = vector.shape_cast %19 : vector<8xf32> to vector<8x1xf32>
    %21 = tpu.reciprocal %20 {approx = true} : vector<8x1xf32> -> vector<8x1xf32>
    %22 = vector.broadcast %21 : vector<8x1xf32> to vector<8x8xf32>
    %23 = arith.mulf %18, %22 : vector<8x8xf32>
    %cst_16 = arith.constant dense<0.000000e+00> : vector<8x4xf32>
    %24 = tpu.matmul %23, %10, %cst_16 {dimension_numbers = #tpu.dot_dimension_numbers<[1], [0], [0], [1], [0, 0, 1, 1], [], []>} : vector<8x8xf32>, vector<8x4xf32>, vector<8x4xf32> -> vector<8x4xf32>
    %c0_17 = arith.constant 0 : index
    %c0_18 = arith.constant 0 : index
    %25 = vector.load %arg10[%c0_17, %c0_18] : memref<8x32xf32, #tpu.memory_space<vmem>>, vector<8x4xf32>
    tpu.vector_store %arg10[%c0_17, %c0_18], %24 {strides = array<i32>} : memref<8x32xf32, #tpu.memory_space<vmem>>, vector<8x4xf32>,
    %c0_19 = arith.constant 0 : index
    %c4 = arith.constant 4 : index
    %26 = vector.load %arg9[%c0_19, %c4] : memref<8x96xf32, #tpu.memory_space<vmem>>, vector<8x4xf32>
    %c0_20 = arith.constant 0 : index
    %c36 = arith.constant 36 : index
    %27 = vector.load %arg9[%c0_20, %c36] : memref<8x96xf32, #tpu.memory_space<vmem>>, vector<8x4xf32>
    %c0_21 = arith.constant 0 : index
    %c68 = arith.constant 68 : index
    %28 = vector.load %arg9[%c0_21, %c68] : memref<8x96xf32, #tpu.memory_space<vmem>>, vector<8x4xf32>
    %cst_22 = arith.constant dense<0.000000e+00> : vector<8x8xf32>
    %29 = tpu.matmul %26, %27, %cst_22 {dimension_numbers = #tpu.dot_dimension_numbers<[1], [1], [0], [0], [0, 0, 1, 0], [], []>} : vector<8x4xf32>, vector<8x4xf32>, vector<8x8xf32> -> vector<8x8xf32>
    %cst_23 = arith.constant 5.000000e-01 : f32
    %30 = vector.broadcast %cst_23 : f32 to vector<8x8xf32>
    %31 = arith.mulf %29, %30 : vector<8x8xf32>
    %cst_24 = arith.constant dense<0xFF800000> : vector<8xf32>
    %32 = vector.multi_reduction <maximumf>, %31, %cst_24 [1] : vector<8x8xf32> to vector<8xf32>
    %33 = vector.shape_cast %32 : vector<8xf32> to vector<8x1xf32>
    %34 = vector.broadcast %33 : vector<8x1xf32> to vector<8x8xf32>
    %35 = arith.subf %31, %34 : vector<8x8xf32>
    %36 = math.exp %35 : vector<8x8xf32>
    %cst_25 = arith.constant dense<0.000000e+00> : vector<8xf32>
    %37 = vector.multi_reduction <add>, %36, %cst_25 [1] : vector<8x8xf32> to vector<8xf32>
    %38 = vector.shape_cast %37 : vector<8xf32> to vector<8x1xf32>
    %39 = tpu.reciprocal %38 {approx = true} : vector<8x1xf32> -> vector<8x1xf32>
    %40 = vector.broadcast %39 : vector<8x1xf32> to vector<8x8xf32>
    %41 = arith.mulf %36, %40 : vector<8x8xf32>
    %cst_26 = arith.constant dense<0.000000e+00> : vector<8x4xf32>
    %42 = tpu.matmul %41, %28, %cst_26 {dimension_numbers = #tpu.dot_dimension_numbers<[1], [0], [0], [1], [0, 0, 1, 1], [], []>} : vector<8x8xf32>, vector<8x4xf32>, vector<8x4xf32> -> vector<8x4xf32>
    %c0_27 = arith.constant 0 : index
    %c4_28 = arith.constant 4 : index
    %43 = vector.load %arg10[%c0_27, %c4_28] : memref<8x32xf32, #tpu.memory_space<vmem>>, vector<8x4xf32>
    tpu.vector_store %arg10[%c0_27, %c4_28], %42 {strides = array<i32>} : memref<8x32xf32, #tpu.memory_space<vmem>>, vector<8x4xf32>,
    %c0_29 = arith.constant 0 : index
    %c8 = arith.constant 8 : index
    %44 = vector.load %arg9[%c0_29, %c8] : memref<8x96xf32, #tpu.memory_space<vmem>>, vector<8x4xf32>
    %c0_30 = arith.constant 0 : index
    %c40 = arith.constant 40 : index
    %45 = vector.load %arg9[%c0_30, %c40] : memref<8x96xf32, #tpu.memory_space<vmem>>, vector<8x4xf32>
    %c0_31 = arith.constant 0 : index
    %c72 = arith.constant 72 : index
    %46 = vector.load %arg9[%c0_31, %c72] : memref<8x96xf32, #tpu.memory_space<vmem>>, vector<8x4xf32>
    %cst_32 = arith.constant dense<0.000000e+00> : vector<8x8xf32>
    %47 = tpu.matmul %44, %45, %cst_32 {dimension_numbers = #tpu.dot_dimension_numbers<[1], [1], [0], [0], [0, 0, 1, 0], [], []>} : vector<8x4xf32>, vector<8x4xf32>, vector<8x8xf32> -> vector<8x8xf32>
    %cst_33 = arith.constant 5.000000e-01 : f32
    %48 = vector.broadcast %cst_33 : f32 to vector<8x8xf32>
    %49 = arith.mulf %47, %48 : vector<8x8xf32>
    %cst_34 = arith.constant dense<0xFF800000> : vector<8xf32>
    %50 = vector.multi_reduction <maximumf>, %49, %cst_34 [1] : vector<8x8xf32> to vector<8xf32>
    %51 = vector.shape_cast %50 : vector<8xf32> to vector<8x1xf32>
    %52 = vector.broadcast %51 : vector<8x1xf32> to vector<8x8xf32>
    %53 = arith.subf %49, %52 : vector<8x8xf32>
    %54 = math.exp %53 : vector<8x8xf32>
    %cst_35 = arith.constant dense<0.000000e+00> : vector<8xf32>
    %55 = vector.multi_reduction <add>, %54, %cst_35 [1] : vector<8x8xf32> to vector<8xf32>
    %56 = vector.shape_cast %55 : vector<8xf32> to vector<8x1xf32>
    %57 = tpu.reciprocal %56 {approx = true} : vector<8x1xf32> -> vector<8x1xf32>
    %58 = vector.broadcast %57 : vector<8x1xf32> to vector<8x8xf32>
    %59 = arith.mulf %54, %58 : vector<8x8xf32>
    %cst_36 = arith.constant dense<0.000000e+00> : vector<8x4xf32>
    %60 = tpu.matmul %59, %46, %cst_36 {dimension_numbers = #tpu.dot_dimension_numbers<[1], [0], [0], [1], [0, 0, 1, 1], [], []>} : vector<8x8xf32>, vector<8x4xf32>, vector<8x4xf32> -> vector<8x4xf32>
    %c0_37 = arith.constant 0 : index
    %c8_38 = arith.constant 8 : index
    %61 = vector.load %arg10[%c0_37, %c8_38] : memref<8x32xf32, #tpu.memory_space<vmem>>, vector<8x4xf32>
    tpu.vector_store %arg10[%c0_37, %c8_38], %60 {strides = array<i32>} : memref<8x32xf32, #tpu.memory_space<vmem>>, vector<8x4xf32>,
    %c0_39 = arith.constant 0 : index
    %c12 = arith.constant 12 : index
    %62 = vector.load %arg9[%c0_39, %c12] : memref<8x96xf32, #tpu.memory_space<vmem>>, vector<8x4xf32>
    %c0_40 = arith.constant 0 : index
    %c44 = arith.constant 44 : index
    %63 = vector.load %arg9[%c0_40, %c44] : memref<8x96xf32, #tpu.memory_space<vmem>>, vector<8x4xf32>
    %c0_41 = arith.constant 0 : index
    %c76 = arith.constant 76 : index
    %64 = vector.load %arg9[%c0_41, %c76] : memref<8x96xf32, #tpu.memory_space<vmem>>, vector<8x4xf32>
    %cst_42 = arith.constant dense<0.000000e+00> : vector<8x8xf32>
    %65 = tpu.matmul %62, %63, %cst_42 {dimension_numbers = #tpu.dot_dimension_numbers<[1], [1], [0], [0], [0, 0, 1, 0], [], []>} : vector<8x4xf32>, vector<8x4xf32>, vector<8x8xf32> -> vector<8x8xf32>
    %cst_43 = arith.constant 5.000000e-01 : f32
    %66 = vector.broadcast %cst_43 : f32 to vector<8x8xf32>
    %67 = arith.mulf %65, %66 : vector<8x8xf32>
    %cst_44 = arith.constant dense<0xFF800000> : vector<8xf32>
    %68 = vector.multi_reduction <maximumf>, %67, %cst_44 [1] : vector<8x8xf32> to vector<8xf32>
    %69 = vector.shape_cast %68 : vector<8xf32> to vector<8x1xf32>
    %70 = vector.broadcast %69 : vector<8x1xf32> to vector<8x8xf32>
    %71 = arith.subf %67, %70 : vector<8x8xf32>
    %72 = math.exp %71 : vector<8x8xf32>
    %cst_45 = arith.constant dense<0.000000e+00> : vector<8xf32>
    %73 = vector.multi_reduction <add>, %72, %cst_45 [1] : vector<8x8xf32> to vector<8xf32>
    %74 = vector.shape_cast %73 : vector<8xf32> to vector<8x1xf32>
    %75 = tpu.reciprocal %74 {approx = true} : vector<8x1xf32> -> vector<8x1xf32>
    %76 = vector.broadcast %75 : vector<8x1xf32> to vector<8x8xf32>
    %77 = arith.mulf %72, %76 : vector<8x8xf32>
    %cst_46 = arith.constant dense<0.000000e+00> : vector<8x4xf32>
    %78 = tpu.matmul %77, %64, %cst_46 {dimension_numbers = #tpu.dot_dimension_numbers<[1], [0], [0], [1], [0, 0, 1, 1], [], []>} : vector<8x8xf32>, vector<8x4xf32>, vector<8x4xf32> -> vector<8x4xf32>
    %c0_47 = arith.constant 0 : index
    %c12_48 = arith.constant 12 : index
    %79 = vector.load %arg10[%c0_47, %c12_48] : memref<8x32xf32, #tpu.memory_space<vmem>>, vector<8x4xf32>
    tpu.vector_store %arg10[%c0_47, %c12_48], %78 {strides = array<i32>} : memref<8x32xf32, #tpu.memory_space<vmem>>, vector<8x4xf32>,
    %c0_49 = arith.constant 0 : index
    %c16 = arith.constant 16 : index
    %80 = vector.load %arg9[%c0_49, %c16] : memref<8x96xf32, #tpu.memory_space<vmem>>, vector<8x4xf32>
    %c0_50 = arith.constant 0 : index
    %c48 = arith.constant 48 : index
    %81 = vector.load %arg9[%c0_50, %c48] : memref<8x96xf32, #tpu.memory_space<vmem>>, vector<8x4xf32>
    %c0_51 = arith.constant 0 : index
    %c80 = arith.constant 80 : index
    %82 = vector.load %arg9[%c0_51, %c80] : memref<8x96xf32, #tpu.memory_space<vmem>>, vector<8x4xf32>
    %cst_52 = arith.constant dense<0.000000e+00> : vector<8x8xf32>
    %83 = tpu.matmul %80, %81, %cst_52 {dimension_numbers = #tpu.dot_dimension_numbers<[1], [1], [0], [0], [0, 0, 1, 0], [], []>} : vector<8x4xf32>, vector<8x4xf32>, vector<8x8xf32> -> vector<8x8xf32>
    %cst_53 = arith.constant 5.000000e-01 : f32
    %84 = vector.broadcast %cst_53 : f32 to vector<8x8xf32>
    %85 = arith.mulf %83, %84 : vector<8x8xf32>
    %cst_54 = arith.constant dense<0xFF800000> : vector<8xf32>
    %86 = vector.multi_reduction <maximumf>, %85, %cst_54 [1] : vector<8x8xf32> to vector<8xf32>
    %87 = vector.shape_cast %86 : vector<8xf32> to vector<8x1xf32>
    %88 = vector.broadcast %87 : vector<8x1xf32> to vector<8x8xf32>
    %89 = arith.subf %85, %88 : vector<8x8xf32>
    %90 = math.exp %89 : vector<8x8xf32>
    %cst_55 = arith.constant dense<0.000000e+00> : vector<8xf32>
    %91 = vector.multi_reduction <add>, %90, %cst_55 [1] : vector<8x8xf32> to vector<8xf32>
    %92 = vector.shape_cast %91 : vector<8xf32> to vector<8x1xf32>
    %93 = tpu.reciprocal %92 {approx = true} : vector<8x1xf32> -> vector<8x1xf32>
    %94 = vector.broadcast %93 : vector<8x1xf32> to vector<8x8xf32>
    %95 = arith.mulf %90, %94 : vector<8x8xf32>
    %cst_56 = arith.constant dense<0.000000e+00> : vector<8x4xf32>
    %96 = tpu.matmul %95, %82, %cst_56 {dimension_numbers = #tpu.dot_dimension_numbers<[1], [0], [0], [1], [0, 0, 1, 1], [], []>} : vector<8x8xf32>, vector<8x4xf32>, vector<8x4xf32> -> vector<8x4xf32>
    %c0_57 = arith.constant 0 : index
    %c16_58 = arith.constant 16 : index
    %97 = vector.load %arg10[%c0_57, %c16_58] : memref<8x32xf32, #tpu.memory_space<vmem>>, vector<8x4xf32>
    tpu.vector_store %arg10[%c0_57, %c16_58], %96 {strides = array<i32>} : memref<8x32xf32, #tpu.memory_space<vmem>>, vector<8x4xf32>,
    %c0_59 = arith.constant 0 : index
    %c20 = arith.constant 20 : index
    %98 = vector.load %arg9[%c0_59, %c20] : memref<8x96xf32, #tpu.memory_space<vmem>>, vector<8x4xf32>
    %c0_60 = arith.constant 0 : index
    %c52 = arith.constant 52 : index
    %99 = vector.load %arg9[%c0_60, %c52] : memref<8x96xf32, #tpu.memory_space<vmem>>, vector<8x4xf32>
    %c0_61 = arith.constant 0 : index
    %c84 = arith.constant 84 : index
    %100 = vector.load %arg9[%c0_61, %c84] : memref<8x96xf32, #tpu.memory_space<vmem>>, vector<8x4xf32>
    %cst_62 = arith.constant dense<0.000000e+00> : vector<8x8xf32>
    %101 = tpu.matmul %98, %99, %cst_62 {dimension_numbers = #tpu.dot_dimension_numbers<[1], [1], [0], [0], [0, 0, 1, 0], [], []>} : vector<8x4xf32>, vector<8x4xf32>, vector<8x8xf32> -> vector<8x8xf32>
    %cst_63 = arith.constant 5.000000e-01 : f32
    %102 = vector.broadcast %cst_63 : f32 to vector<8x8xf32>
    %103 = arith.mulf %101, %102 : vector<8x8xf32>
    %cst_64 = arith.constant dense<0xFF800000> : vector<8xf32>
    %104 = vector.multi_reduction <maximumf>, %103, %cst_64 [1] : vector<8x8xf32> to vector<8xf32>
    %105 = vector.shape_cast %104 : vector<8xf32> to vector<8x1xf32>
    %106 = vector.broadcast %105 : vector<8x1xf32> to vector<8x8xf32>
    %107 = arith.subf %103, %106 : vector<8x8xf32>
    %108 = math.exp %107 : vector<8x8xf32>
    %cst_65 = arith.constant dense<0.000000e+00> : vector<8xf32>
    %109 = vector.multi_reduction <add>, %108, %cst_65 [1] : vector<8x8xf32> to vector<8xf32>
    %110 = vector.shape_cast %109 : vector<8xf32> to vector<8x1xf32>
    %111 = tpu.reciprocal %110 {approx = true} : vector<8x1xf32> -> vector<8x1xf32>
    %112 = vector.broadcast %111 : vector<8x1xf32> to vector<8x8xf32>
    %113 = arith.mulf %108, %112 : vector<8x8xf32>
    %cst_66 = arith.constant dense<0.000000e+00> : vector<8x4xf32>
    %114 = tpu.matmul %113, %100, %cst_66 {dimension_numbers = #tpu.dot_dimension_numbers<[1], [0], [0], [1], [0, 0, 1, 1], [], []>} : vector<8x8xf32>, vector<8x4xf32>, vector<8x4xf32> -> vector<8x4xf32>
    %c0_67 = arith.constant 0 : index
    %c20_68 = arith.constant 20 : index
    %115 = vector.load %arg10[%c0_67, %c20_68] : memref<8x32xf32, #tpu.memory_space<vmem>>, vector<8x4xf32>
    tpu.vector_store %arg10[%c0_67, %c20_68], %114 {strides = array<i32>} : memref<8x32xf32, #tpu.memory_space<vmem>>, vector<8x4xf32>,
    %c0_69 = arith.constant 0 : index
    %c24 = arith.constant 24 : index
    %116 = vector.load %arg9[%c0_69, %c24] : memref<8x96xf32, #tpu.memory_space<vmem>>, vector<8x4xf32>
    %c0_70 = arith.constant 0 : index
    %c56 = arith.constant 56 : index
    %117 = vector.load %arg9[%c0_70, %c56] : memref<8x96xf32, #tpu.memory_space<vmem>>, vector<8x4xf32>
    %c0_71 = arith.constant 0 : index
    %c88 = arith.constant 88 : index
    %118 = vector.load %arg9[%c0_71, %c88] : memref<8x96xf32, #tpu.memory_space<vmem>>, vector<8x4xf32>
    %cst_72 = arith.constant dense<0.000000e+00> : vector<8x8xf32>
    %119 = tpu.matmul %116, %117, %cst_72 {dimension_numbers = #tpu.dot_dimension_numbers<[1], [1], [0], [0], [0, 0, 1, 0], [], []>} : vector<8x4xf32>, vector<8x4xf32>, vector<8x8xf32> -> vector<8x8xf32>
    %cst_73 = arith.constant 5.000000e-01 : f32
    %120 = vector.broadcast %cst_73 : f32 to vector<8x8xf32>
    %121 = arith.mulf %119, %120 : vector<8x8xf32>
    %cst_74 = arith.constant dense<0xFF800000> : vector<8xf32>
    %122 = vector.multi_reduction <maximumf>, %121, %cst_74 [1] : vector<8x8xf32> to vector<8xf32>
    %123 = vector.shape_cast %122 : vector<8xf32> to vector<8x1xf32>
    %124 = vector.broadcast %123 : vector<8x1xf32> to vector<8x8xf32>
    %125 = arith.subf %121, %124 : vector<8x8xf32>
    %126 = math.exp %125 : vector<8x8xf32>
    %cst_75 = arith.constant dense<0.000000e+00> : vector<8xf32>
    %127 = vector.multi_reduction <add>, %126, %cst_75 [1] : vector<8x8xf32> to vector<8xf32>
    %128 = vector.shape_cast %127 : vector<8xf32> to vector<8x1xf32>
    %129 = tpu.reciprocal %128 {approx = true} : vector<8x1xf32> -> vector<8x1xf32>
    %130 = vector.broadcast %129 : vector<8x1xf32> to vector<8x8xf32>
    %131 = arith.mulf %126, %130 : vector<8x8xf32>
    %cst_76 = arith.constant dense<0.000000e+00> : vector<8x4xf32>
    %132 = tpu.matmul %131, %118, %cst_76 {dimension_numbers = #tpu.dot_dimension_numbers<[1], [0], [0], [1], [0, 0, 1, 1], [], []>} : vector<8x8xf32>, vector<8x4xf32>, vector<8x4xf32> -> vector<8x4xf32>
    %c0_77 = arith.constant 0 : index
    %c24_78 = arith.constant 24 : index
    %133 = vector.load %arg10[%c0_77, %c24_78] : memref<8x32xf32, #tpu.memory_space<vmem>>, vector<8x4xf32>
    tpu.vector_store %arg10[%c0_77, %c24_78], %132 {strides = array<i32>} : memref<8x32xf32, #tpu.memory_space<vmem>>, vector<8x4xf32>,
    %c0_79 = arith.constant 0 : index
    %c28 = arith.constant 28 : index
    %134 = vector.load %arg9[%c0_79, %c28] : memref<8x96xf32, #tpu.memory_space<vmem>>, vector<8x4xf32>
    %c0_80 = arith.constant 0 : index
    %c60 = arith.constant 60 : index
    %135 = vector.load %arg9[%c0_80, %c60] : memref<8x96xf32, #tpu.memory_space<vmem>>, vector<8x4xf32>
    %c0_81 = arith.constant 0 : index
    %c92 = arith.constant 92 : index
    %136 = vector.load %arg9[%c0_81, %c92] : memref<8x96xf32, #tpu.memory_space<vmem>>, vector<8x4xf32>
    %cst_82 = arith.constant dense<0.000000e+00> : vector<8x8xf32>
    %137 = tpu.matmul %134, %135, %cst_82 {dimension_numbers = #tpu.dot_dimension_numbers<[1], [1], [0], [0], [0, 0, 1, 0], [], []>} : vector<8x4xf32>, vector<8x4xf32>, vector<8x8xf32> -> vector<8x8xf32>
    %cst_83 = arith.constant 5.000000e-01 : f32
    %138 = vector.broadcast %cst_83 : f32 to vector<8x8xf32>
    %139 = arith.mulf %137, %138 : vector<8x8xf32>
    %cst_84 = arith.constant dense<0xFF800000> : vector<8xf32>
    %140 = vector.multi_reduction <maximumf>, %139, %cst_84 [1] : vector<8x8xf32> to vector<8xf32>
    %141 = vector.shape_cast %140 : vector<8xf32> to vector<8x1xf32>
    %142 = vector.broadcast %141 : vector<8x1xf32> to vector<8x8xf32>
    %143 = arith.subf %139, %142 : vector<8x8xf32>
    %144 = math.exp %143 : vector<8x8xf32>
    %cst_85 = arith.constant dense<0.000000e+00> : vector<8xf32>
    %145 = vector.multi_reduction <add>, %144, %cst_85 [1] : vector<8x8xf32> to vector<8xf32>
    %146 = vector.shape_cast %145 : vector<8xf32> to vector<8x1xf32>
    %147 = tpu.reciprocal %146 {approx = true} : vector<8x1xf32> -> vector<8x1xf32>
    %148 = vector.broadcast %147 : vector<8x1xf32> to vector<8x8xf32>
    %149 = arith.mulf %144, %148 : vector<8x8xf32>
    %cst_86 = arith.constant dense<0.000000e+00> : vector<8x4xf32>
    %150 = tpu.matmul %149, %136, %cst_86 {dimension_numbers = #tpu.dot_dimension_numbers<[1], [0], [0], [1], [0, 0, 1, 1], [], []>} : vector<8x8xf32>, vector<8x4xf32>, vector<8x4xf32> -> vector<8x4xf32>
    %c0_87 = arith.constant 0 : index
    %c28_88 = arith.constant 28 : index
    %151 = vector.load %arg10[%c0_87, %c28_88] : memref<8x32xf32, #tpu.memory_space<vmem>>, vector<8x4xf32>
    tpu.vector_store %arg10[%c0_87, %c28_88], %150 {strides = array<i32>} : memref<8x32xf32, #tpu.memory_space<vmem>>, vector<8x4xf32>,
    %c0_89 = arith.constant 0 : index
    %c0_90 = arith.constant 0 : index
    %152 = vector.load %arg10[%c0_89, %c0_90] : memref<8x32xf32, #tpu.memory_space<vmem>>, vector<8x32xf32>
    %c0_91 = arith.constant 0 : index
    %c0_92 = arith.constant 0 : index
    %153 = vector.load %arg4[%c0_91, %c0_92] : memref<32x32xf32, #tpu.memory_space<vmem>>, vector<32x32xf32>
    %cst_93 = arith.constant dense<0.000000e+00> : vector<8x32xf32>
    %154 = tpu.matmul %152, %153, %cst_93 {dimension_numbers = #tpu.dot_dimension_numbers<[1], [0], [0], [1], [0, 0, 1, 1], [], []>} : vector<8x32xf32>, vector<32x32xf32>, vector<8x32xf32> -> vector<8x32xf32>
    %c0_94 = arith.constant 0 : index
    %c0_95 = arith.constant 0 : index
    %155 = vector.load %arg5[%c0_94, %c0_95] : memref<1x32xf32, #tpu.memory_space<vmem>>, vector<1x32xf32>
    %156 = vector.broadcast %155 : vector<1x32xf32> to vector<8x32xf32>
    %157 = arith.addf %154, %156 : vector<8x32xf32>
    %158 = arith.addf %1, %157 : vector<8x32xf32>
    %c0_96 = arith.constant 0 : index
    %c0_97 = arith.constant 0 : index
    %159 = vector.load %arg6[%c0_96, %c0_97] : memref<1x32xf32, #tpu.memory_space<vmem>>, vector<1x32xf32>
    %c0_98 = arith.constant 0 : index
    %c0_99 = arith.constant 0 : index
    %160 = vector.load %arg7[%c0_98, %c0_99] : memref<1x32xf32, #tpu.memory_space<vmem>>, vector<1x32xf32>
    %cst_100 = arith.constant dense<0.000000e+00> : vector<8xf32>
    %161 = vector.multi_reduction <add>, %158, %cst_100 [1] : vector<8x32xf32> to vector<8xf32>
    %162 = vector.shape_cast %161 : vector<8xf32> to vector<8x1xf32>
    %cst_101 = arith.constant 3.200000e+01 : f32
    %163 = vector.broadcast %cst_101 : f32 to vector<8x1xf32>
    %164 = arith.divf %162, %163 : vector<8x1xf32>
    %165 = vector.broadcast %164 : vector<8x1xf32> to vector<8x32xf32>
    %166 = arith.subf %158, %165 : vector<8x32xf32>
    %167 = arith.mulf %166, %166 : vector<8x32xf32>
    %cst_102 = arith.constant dense<0.000000e+00> : vector<8xf32>
    %168 = vector.multi_reduction <add>, %167, %cst_102 [1] : vector<8x32xf32> to vector<8xf32>
    %169 = vector.shape_cast %168 : vector<8xf32> to vector<8x1xf32>
    %cst_103 = arith.constant 3.200000e+01 : f32
    %170 = vector.broadcast %cst_103 : f32 to vector<8x1xf32>
    %171 = arith.divf %169, %170 : vector<8x1xf32>
    %cst_104 = arith.constant 9.99999974E-6 : f32
    %172 = vector.broadcast %cst_104 : f32 to vector<8x1xf32>
    %173 = arith.addf %171, %172 : vector<8x1xf32>
    %174 = math.rsqrt %173 : vector<8x1xf32>
    %175 = vector.broadcast %174 : vector<8x1xf32> to vector<8x32xf32>
    %176 = arith.mulf %166, %175 : vector<8x32xf32>
    %177 = vector.broadcast %159 : vector<1x32xf32> to vector<8x32xf32>
    %178 = arith.mulf %176, %177 : vector<8x32xf32>
    %179 = vector.broadcast %160 : vector<1x32xf32> to vector<8x32xf32>
    %180 = arith.addf %178, %179 : vector<8x32xf32>
    %c0_105 = arith.constant 0 : index
    %c0_106 = arith.constant 0 : index
    %c0_107 = arith.constant 0 : index
    %181 = vector.load %arg8[%c0_105, %c0_106, %c0_107] : memref<1x8x32xf32, #tpu.memory_space<vmem>>, vector<1x8x32xf32>
    %182 = vector.shape_cast %181 : vector<1x8x32xf32> to vector<8x32xf32>
    %183 = vector.shape_cast %180 : vector<8x32xf32> to vector<1x8x32xf32>
    tpu.vector_store %arg8[%c0_105, %c0_106, %c0_107], %183 {strides = array<i32>} : memref<1x8x32xf32, #tpu.memory_space<vmem>>, vector<1x8x32xf32>,
    return
  }
  func.func @transform_0(%arg0: i32) -> (i32, i32, i32) {
    %c0_i32 = arith.constant 0 : i32
    %c0_i32_0 = arith.constant 0 : i32
    %c0_i32_1 = arith.constant 0 : i32
    return %arg0, %c0_i32, %c0_i32_0 : i32, i32, i32
  }
  func.func @transform_1(%arg0: i32) -> (i32, i32) {
    %c0_i32 = arith.constant 0 : i32
    %c0_i32_0 = arith.constant 0 : i32
    %c0_i32_1 = arith.constant 0 : i32
    return %c0_i32, %c0_i32_0 : i32, i32
  }
  func.func @transform_2(%arg0: i32) -> (i32, i32) {
    %c0_i32 = arith.constant 0 : i32
    %c0_i32_0 = arith.constant 0 : i32
    %c0_i32_1 = arith.constant 0 : i32
    return %c0_i32, %c0_i32_0 : i32, i32
  }
  func.func @transform_3(%arg0: i32) -> (i32, i32) {
    %c0_i32 = arith.constant 0 : i32
    %c0_i32_0 = arith.constant 0 : i32
    %c0_i32_1 = arith.constant 0 : i32
    return %c0_i32, %c0_i32_0 : i32, i32
  }
  func.func @transform_4(%arg0: i32) -> (i32, i32) {
    %c0_i32 = arith.constant 0 : i32
    %c0_i32_0 = arith.constant 0 : i32
    %c0_i32_1 = arith.constant 0 : i32
    return %c0_i32, %c0_i32_0 : i32, i32
  }
  func.func @transform_5(%arg0: i32) -> (i32, i32) {
    %c0_i32 = arith.constant 0 : i32
    %c0_i32_0 = arith.constant 0 : i32
    %c0_i32_1 = arith.constant 0 : i32
    return %c0_i32, %c0_i32_0 : i32, i32
  }
  func.func @transform_6(%arg0: i32) -> (i32, i32) {
    %c0_i32 = arith.constant 0 : i32
    %c0_i32_0 = arith.constant 0 : i32
    %c0_i32_1 = arith.constant 0 : i32
    return %c0_i32, %c0_i32_0 : i32, i32
  }
  func.func @transform_7(%arg0: i32) -> (i32, i32, i32) {
    %c0_i32 = arith.constant 0 : i32
    %c0_i32_0 = arith.constant 0 : i32
    %c0_i32_1 = arith.constant 0 : i32
    return %arg0, %c0_i32, %c0_i32_0 : i32, i32, i32
  }
}

</mosaic_0001>

<bundles_post_ra>
// kernel: transformer_with_dynmoe.4
= control target key start
LH: loop header
LB: loop body
LE: loop exit
PB: predicated region body
PF: predicated region fallthrough
CT: control target
= control target key end

     0   :  { %vm39_vm0 = vcmask 261120   ;;  %vm196_vm1 = vcmask 523264   ;;  %s535_s1 = inlined_call_operand.vmem [shape: f32[32,64], index: 1, kind: input, shape index: {}]   ;;  %s536_s0 = inlined_call_operand.vmem [shape: f32[16,32], index: 0, kind: input, shape index: {}]   ;;  %s537_s3 = inlined_call_operand.vmem [shape: f32[64,32], index: 3, kind: input, shape index: {}]   ;;  %s538_s2 = inlined_call_operand.vmem [shape: f32[1,64], index: 2, kind: input, shape index: {}]   ;;  %s539_s4 = inlined_call_operand.vmem [shape: f32[1,32], index: 4, kind: input, shape index: {}]   ;;  %s540_s5 = inlined_call_operand.vmem [shape: f32[1,32], index: 5, kind: input, shape index: {}]   ;;  %s541_s6 = inlined_call_operand.vmem [shape: f32[1,32], index: 6, kind: input, shape index: {}]   ;;  %s542_s7 = inlined_call_operand.vmem [shape: f32[16,32], index: 7, kind: output, shape index: {}]  }
   0x1   :  { %v28_v0 = vld [vmem:[%s535_s1] sm:$0xff]  ;;  %v29_v1 = vld [vmem:[%s535_s1 + $0x8] sm:$0xff]  ;;  %v30_v2 = vld [vmem:[%s535_s1 + $0x10] sm:$0xff] }
   0x2   :  { %v387_v3 = vpack.c.bf16 %v29_v1, %v28_v0  ;;  %v31_v4 = vld [vmem:[%s535_s1 + $0x18] sm:$0xff]  ;;  %v474_v5 = vld [vmem:[%s536_s0] sm:$0xff]  ;;  %v481_v7 = vld [vmem:[%s536_s0 + $0x8] sm:$0xff] }
   0x3   :  { %v391_v6 = vpack.c.bf16 %v31_v4, %v30_v2  ;;  %365 = vmatprep.mubr.msk.f32.mxu0 %vm39_vm0, %v474_v5  ;;  %v181_v8 = vld [vmem:[%s537_s3] sm:$0xff]  ;;  %v182_v9 = vld [vmem:[%s537_s3 + $0x8] sm:$0xff]  ;;  %v183_v11 = vld [vmem:[%s537_s3 + $0x10] sm:$0xff] }
   0x4   :  { %388 = vmatprep.subr.bf16.mxu0 %v387_v3  ;;  %v395_v10 = vpack.c.bf16 %v182_v9, %v181_v8  ;;  %v184_v12 = vld [vmem:[%s537_s3 + $0x18] sm:$0xff]  ;;  %v185_v14 = vld [vmem:[%s537_s3 + $0x20] sm:$0xff]  ;;  %v186_v15 = vld [vmem:[%s537_s3 + $0x28] sm:$0xff] }
   0x5   :  { %390 = vmatpush3.bf16.msra.mxu0 %v387_v3  ;;  %v399_v13 = vpack.c.bf16 %v184_v12, %v183_v11  ;;  %v403_v16 = vpack.c.bf16 %v186_v15, %v185_v14  ;;  %v187_v17 = vld [vmem:[%s537_s3 + $0x30] sm:$0xff]  ;;  %v188_v18 = vld [vmem:[%s537_s3 + $0x38] sm:$0xff]  ;;  %v331_v20 = vld [vmem:[%s538_s2] ss:$0 sm:$0xff] }
   0x6   :  { %392 = vmatprep.subr.bf16.mxu0 %v391_v6  ;;  %396 = vmatprep.subr.bf16.mxu1 %v395_v10  ;;  %v407_v19 = vpack.c.bf16 %v188_v18, %v187_v17 }
   0x7   :  { %398 = vmatpush3.bf16.msra.mxu1 %v395_v10 }
   0x8   :  { %400 = vmatprep.subr.bf16.mxu1 %v399_v13 }
   0x9   :  { %394 = vmatpush3.bf16.msra.mxu0 %v391_v6 }
   0xb   :  { %402 = vmatpush3.bf16.msra.mxu1 %v399_v13 }
   0xc   :  { %366 = vmatmul.mubr.msk.f32.vlgmr.msra.gmra.mrb[0].mxu0 %vm39_vm0, %v481_v7  ;;  %404 = vmatprep.subr.bf16.mxu1 %v403_v16 }
   0xf   :  { %406 = vmatpush3.bf16.msra.mxu1 %v403_v16 }
  0x10   :  { %408 = vmatprep.subr.bf16.mxu1 %v407_v19 }
  0x13   :  { %410 = vmatpush3.bf16.msra.mxu1 %v407_v19 }
  0xdf   :  { %v367_v21 = vpop.f32.mrb[0].mxu0 }
  0xe0   :  { %v118_v22 = vadd.f32 %v367_v21, %v331_v20  ;;  %v112_v23 = vpop.f32.mrb[1].mxu0  ;;  %v336_v21 = vld [vmem:[%s539_s4] ss:$0 sm:$0xff] }
  0xe1   :  { %v113_v24 = vadd.f32 %v331_v20, %v112_v23 }
  0xe2   :  { %v122_v25 = vmul.f32 0.70710677, %v118_v22  ;;  %v176_v18 = vmul.f32 0.5, %v118_v22 }
  0xe3   :  { %v121_v26 = vmul.f32 0.70710677, %v113_v24  ;;  %v175_v16 = vmul.f32 0.5, %v113_v24 }
  0xe4   :  { %v335_v27 = vclamps-f32 %v122_v25, 4.0 }
  0xe5   :  { %v334_v28 = vclamps-f32 %v121_v26, 4.0 }
  0xe6   :  { %v128_v29 = vmul.f32 %v335_v27, %v335_v27 }
  0xe7   :  { %v127_v30 = vmul.f32 %v334_v28, %v334_v28 }
  0xe8   :  { %v148_v31 = vmul.f32 -1.1791603e-07, %v128_v29  ;;  %v130_v32 = vmul.f32 0.00022905065, %v128_v29 }
  0xe9   :  { %v147_v33 = vmul.f32 -1.1791603e-07, %v127_v30  ;;  %v129_v35 = vmul.f32 0.00022905065, %v127_v30 }
  0xea   :  { %v150_v34 = vadd.f32 2.3547966e-05, %v148_v31  ;;  %v132_v38 = vadd.f32 0.003408291, %v130_v32 }
  0xeb   :  { %v149_v36 = vadd.f32 2.3547966e-05, %v147_v33  ;;  %v131_v41 = vadd.f32 0.003408291, %v129_v35 }
  0xec   :  { %v152_v37 = vmul.f32 %v150_v34, %v128_v29  ;;  %v134_v44 = vmul.f32 %v132_v38, %v128_v29 }
  0xed   :  { %v151_v39 = vmul.f32 %v149_v36, %v127_v30  ;;  %v133_v47 = vmul.f32 %v131_v41, %v127_v30 }
  0xee   :  { %v154_v40 = vadd.f32 0.0010179626, %v152_v37  ;;  %v136_v50 = vadd.f32 0.050955694, %v134_v44 }
  0xef   :  { %v153_v42 = vadd.f32 0.0010179626, %v151_v39  ;;  %v135_v53 = vadd.f32 0.050955694, %v133_v47  ;;  %v340_v47 = vld [vmem:[%s541_s6] ss:$0 sm:$0xff] }
  0xf0   :  { %v156_v43 = vmul.f32 %v154_v40, %v128_v29  ;;  %v138_v56 = vmul.f32 %v136_v50, %v128_v29 }
  0xf1   :  { %v155_v45 = vmul.f32 %v153_v42, %v127_v30  ;;  %v137_v59 = vmul.f32 %v135_v53, %v127_v30 }
  0xf2   :  { %v158_v46 = vadd.f32 0.01407047, %v156_v43  ;;  %v140_v62 = vadd.f32 0.18520832, %v138_v56 }
  0xf3   :  { %v157_v48 = vadd.f32 0.01407047, %v155_v45  ;;  %v139_v1 = vadd.f32 0.18520832, %v137_v59  ;;  %v339_v45 = vld [vmem:[%s540_s5] ss:$0 sm:$0xff] }
  0xf4   :  { %v160_v49 = vmul.f32 %v158_v46, %v128_v29  ;;  %v142_v3 = vmul.f32 %v140_v62, %v128_v29 }
  0xf5   :  { %v159_v51 = vmul.f32 %v157_v48, %v127_v30  ;;  %v141_v4 = vmul.f32 %v139_v1, %v127_v30 }
  0xf6   :  { %v162_v52 = vadd.f32 0.11098505, %v160_v49  ;;  %v144_v6 = vadd.f32 1.1283791, %v142_v3 }
  0xf7   :  { %v161_v54 = vadd.f32 0.11098505, %v159_v51  ;;  %v143_v8 = vadd.f32 1.1283791, %v141_v4 }
  0xf8   :  { %v164_v55 = vmul.f32 %v162_v52, %v128_v29  ;;  %v146_v9 = vmul.f32 %v335_v27, %v144_v6 }
  0xf9   :  { %v163_v57 = vmul.f32 %v161_v54, %v127_v30  ;;  %v145_v11 = vmul.f32 %v334_v28, %v143_v8 }
  0xfa   :  { %v166_v58 = vadd.f32 0.49746925, %v164_v55 }
  0xfb   :  { %v165_v60 = vadd.f32 0.49746925, %v163_v57 }
  0xfc   :  { %v168_v61 = vmul.f32 %v166_v58, %v128_v29 }
  0xfd   :  { %v167_v63 = vmul.f32 %v165_v60, %v127_v30 }
  0xfe   :  { %v170_v0 = vadd.f32 1.0, %v168_v61 }
  0xff   :  { %v169_v2 = vadd.f32 1.0, %v167_v63 }
 0x100   :  { %411 = vrcp.f32 %v170_v0 }
 0x101   :  { %413 = vrcp.f32 %v169_v2 }
 0x10a   :  { %v412_v10 = vpop.eup %411 }
 0x10b   :  { %v414_v12 = vpop.eup %413  ;;  %v174_v13 = vmul.f32 %v412_v10, %v146_v9 }
 0x10c   :  { %v173_v14 = vmul.f32 %v414_v12, %v145_v11 }
 0x10d   :  { %v178_v15 = vadd.f32 1.0, %v174_v13 }
 0x10e   :  { %v177_v17 = vadd.f32 1.0, %v173_v14 }
 0x10f   :  { %v180_v20 = vmul.f32 %v178_v15, %v176_v18 }
 0x110   :  { %v179_v19 = vmul.f32 %v177_v17, %v175_v16 }
 0x112   :  { %384 = vmatprep.mubr.msk.f32.mxu1 %vm196_vm1, %v179_v19 }
 0x113   :  { %385 = vmatmul.mubr.msk.f32.vlgmr.msra.gmra.mrb[0].mxu1 %vm196_vm1, %v180_v20 }
 0x1e6   :  { %v386_v23 = vpop.f32.mrb[0].mxu1 }
 0x1e7   :  { %v269_v25 = vpop.f32.mrb[1].mxu1  ;;  %v275_v26 = vadd.f32 %v386_v23, %v336_v21 }
 0x1e8   :  { %v270_v27 = vadd.f32 %v336_v21, %v269_v25 }
 0x1e9   :  { %v279_v24 = vadd.f32 %v275_v26, %v481_v7 }
 0x1ea   :  { %v278_v28 = vadd.f32 %v270_v27, %v474_v5 }
 0x1eb   :  { %v285_v22 = vsel %vm39_vm0, %v279_v24, 0.0 }
 0x1ec   :  { %v282_v29 = vsel %vm39_vm0, %v278_v28, 0.0 }
 0x1ed   :  { %283 = vadd.xlane.f32.xlu0 %v282_v29 }
 0x1f1   :  { %286 = vadd.xlane.f32.xlu0 %v285_v22 }
 0x27a   :  { %v284_v30 = vpop.xlane.xlu0 %283 }
 0x27b   :  { %v289_v31 = vmul.f32 0.03125, %v284_v30 }
 0x27d   :  { %v291_v32 = vsub.f32 %v278_v28, %v289_v31 }
 0x27e   :  { %v287_v33 = vpop.xlane.xlu0 %286 }
 0x27f   :  { %v290_v34 = vmul.f32 0.03125, %v287_v33  ;;  %v293_v35 = vmul.f32 %v291_v32, %v291_v32 }
 0x281   :  { %v292_v36 = vsub.f32 %v279_v24, %v290_v34  ;;  %v295_v37 = vsel %vm39_vm0, %v293_v35, 0.0 }
 0x282   :  { %296 = vadd.xlane.f32.xlu1 %v295_v37 }
 0x283   :  { %v294_v38 = vmul.f32 %v292_v36, %v292_v36 }
 0x285   :  { %v298_v5 = vsel %vm39_vm0, %v294_v38, 0.0 }
 0x286   :  { %299 = vadd.xlane.f32.xlu1 %v298_v5 }
 0x30f   :  { %v297_v39 = vpop.xlane.xlu1 %296 }
 0x310   :  { %v301_v7 = vmul.f32 0.03125, %v297_v39 }
 0x312   :  { %v303_v40 = vadd.f32 1e-05, %v301_v7 }
 0x313   :  { %v300_v41 = vpop.xlane.xlu1 %299 }
 0x314   :  { %415 = vrsqrt.f32 %v303_v40  ;;  %v302_v42 = vmul.f32 0.03125, %v300_v41 }
 0x316   :  { %v304_v43 = vadd.f32 1e-05, %v302_v42 }
 0x318   :  { %417 = vrsqrt.f32 %v304_v43 }
 0x31e   :  { %v416_v44 = vpop.eup %415 }
 0x31f   :  { %v307_v46 = vmul.f32 %v416_v44, %v291_v32 }
 0x321   :  { %v315_v48 = vmul.f32 %v339_v45, %v307_v46 }
 0x322   :  { %v418_v49 = vpop.eup %417 }
 0x323   :  { %v323_v50 = vadd.f32 %v340_v47, %v315_v48  ;;  %v308_v51 = vmul.f32 %v418_v49, %v292_v36 }
 0x325   :  { %325 = vst.msk [vmem:[%s542_s7] sm:$0xff] %vm39_vm0, %v323_v50  ;;  %v316_v52 = vmul.f32 %v339_v45, %v308_v51 }
 0x327   :  { %v324_v53 = vadd.f32 %v340_v47, %v316_v52 }
 0x329   :  { %326 = vst.msk [vmem:[%s542_s7 + $0x8] sm:$0xff] %vm39_vm0, %v324_v53 }

// kernel: transformer_with_dynmoe.5
= control target key start
LH: loop header
LB: loop body
LE: loop exit
PB: predicated region body
PF: predicated region fallthrough
CT: control target
= control target key end

     0   :  { %s623_s0 = inlined_call_operand.vmem [shape: f32[16,32], index: 0, kind: input, shape index: {}]   ;;  %s624_s1 = inlined_call_operand.vmem [shape: f32[1,32], index: 1, kind: input, shape index: {}]   ;;  %s625_s2 = inlined_call_operand.<no memory space> [shape: f32[1,1], index: 2, kind: input, shape index: {}]   ;;  %s626_s3 = inlined_call_operand.vmem [shape: f32[32,32], index: 3, kind: input, shape index: {}]   ;;  %s627_s4 = inlined_call_operand.vmem [shape: f32[1,32], index: 4, kind: input, shape index: {}]   ;;  %s628_s5 = inlined_call_operand.vmem [shape: f32[32,32], index: 5, kind: input, shape index: {}]   ;;  %s629_s6 = inlined_call_operand.vmem [shape: f32[1,32], index: 6, kind: input, shape index: {}]   ;;  %s630_s7 = inlined_call_operand.hbm [shape: f32[16,32], index: 7, kind: output, shape index: {}]  }
   0x1   :  { %v12_v0 = vstv %s625_s2 }
   0x2   :  { %13 = vst [vmem:[#allocation2] sm:$0x1] %v12_v0 }
   0x3   :  { %v74_v1 = vld [vmem:[%s626_s3] sm:$0xff]  ;;  %v75_v2 = vld [vmem:[%s626_s3 + $0x8] sm:$0xff]  ;;  %v76_v3 = vld [vmem:[%s626_s3 + $0x10] sm:$0xff]  ;;  %vm33_vm0 = vcmask 261120  }
   0x4   :  { %v432_v4 = vpack.c.bf16 %v75_v2, %v74_v1  ;;  %v77_v5 = vld [vmem:[%s626_s3 + $0x18] sm:$0xff]  ;;  %v559_v6 = vld [vmem:[%s623_s0] sm:$0xff]  ;;  %v564_v7 = vld [vmem:[%s623_s0 + $0x8] sm:$0xff] }
   0x5   :  { %v436_v8 = vpack.c.bf16 %v77_v5, %v76_v3  ;;  %418 = vmatprep.mubr.msk.f32.mxu0 %vm33_vm0, %v559_v6  ;;  %v31_v9 = vmul.f32 %v559_v6, %v559_v6  ;;  %v32_v10 = vmul.f32 %v564_v7, %v564_v7 }
   0x6   :  { %14 = vsyncpa [#allocation4], 0  ;;  %433 = vmatprep.subr.bf16.mxu0 %v432_v4  ;;  %v226_v13 = vld [vmem:[%s628_s5] sm:$0xff]  ;;  %v227_v14 = vld [vmem:[%s628_s5 + $0x8] sm:$0xff]  ;;  %v496_v32 = vmov 0   ;;  %s498_s23 = smov [#allocation3]  }
   0x7   :  { %435 = vmatpush3.bf16.msra.mxu0 %v432_v4  ;;  %v34_v11 = vsel %vm33_vm0, %v31_v9, 0.0  ;;  %v37_v12 = vsel %vm33_vm0, %v32_v10, 0.0  ;;  %v440_v15 = vpack.c.bf16 %v227_v14, %v226_v13  ;;  %v228_v16 = vld [vmem:[%s628_s5 + $0x10] sm:$0xff]  ;;  %v229_v17 = vld [vmem:[%s628_s5 + $0x18] sm:$0xff]  ;;  %v386_v24 = vld [vmem:[%s624_s1] ss:$0 sm:$0xff]  ;;  %459 = vset.pattern.permute.xlu1 %v496_v32 }
   0x8   :  { %437 = vmatprep.subr.bf16.mxu0 %v436_v8  ;;  %35 = vadd.xlane.f32.xlu0 %v34_v11  ;;  %v444_v18 = vpack.c.bf16 %v229_v17, %v228_v16  ;;  %v390_v33 = vld [vmem:[%s627_s4] ss:$0 sm:$0xff]  ;;  %s375_s24 = sshll.u32 %s498_s23, 4  ;;  %s376_s24 = int_to_ptr.vmem [resolvable:$true] %s375_s24 }
   0x9   :  { %441 = vmatprep.subr.bf16.mxu1 %v440_v15  ;;  %453 = vset.pattern.permute.xlu0 %v496_v32  ;;  %p477_p1 = scmp.lt.s32.totalorder %s376_s24, %s376_s24 }
   0xa   :  { %443 = vmatpush3.bf16.msra.mxu1 %v440_v15 }
   0xb   :  { %439 = vmatpush3.bf16.msra.mxu0 %v436_v8  ;;  %445 = vmatprep.subr.bf16.mxu1 %v444_v18 }
   0xc   :  { %38 = vadd.xlane.f32.xlu0 %v37_v12 }
   0xe   :  { %419 = vmatmul.mubr.msk.f32.vlgmr.msra.gmra.mrb[0].mxu0 %vm33_vm0, %v564_v7  ;;  %447 = vmatpush3.bf16.msra.mxu1 %v444_v18 }
  0x95   :  { %v36_v19 = vpop.xlane.xlu0 %35 }
  0x96   :  { %v40_v20 = vmax.f32 %v36_v19, 1e-24 }
  0x98   :  { %460 = vrsqrt.f32 %v40_v20 }
  0x99   :  { %v39_v21 = vpop.xlane.xlu0 %38 }
  0x9a   :  { %v41_v22 = vmax.f32 %v39_v21, 1e-24 }
  0x9c   :  { %462 = vrsqrt.f32 %v41_v22 }
  0xa2   :  { %v461_v23 = vpop.eup %460 }
  0xa3   :  { %v44_v25 = vmul.f32 %v461_v23, %v559_v6 }
  0xa5   :  { %v53_v26 = vmul.f32 %v386_v24, %v44_v25 }
  0xa6   :  { %v463_v27 = vpop.eup %462 }
  0xa7   :  { %v55_v28 = vsel %vm33_vm0, %v53_v26, 0.0  ;;  %v45_v29 = vmul.f32 %v463_v27, %v564_v7 }
  0xa8   :  { %56 = vadd.xlane.f32.xlu1 %v55_v28 }
  0xa9   :  { %v54_v30 = vmul.f32 %v386_v24, %v45_v29 }
  0xab   :  { %v58_v31 = vsel %vm33_vm0, %v54_v30, 0.0 }
  0xac   :  { %59 = vadd.xlane.f32.xlu1 %v58_v31 }
  0xe1   :  { %v420_v34 = vpop.f32.mrb[0].mxu0 }
  0xe2   :  { %v163_v35 = vadd.f32 %v420_v34, %v390_v33  ;;  %v157_v36 = vpop.f32.mrb[1].mxu0 }
  0xe3   :  { %v158_v37 = vadd.f32 %v390_v33, %v157_v36  ;;  %v387_v36 = vld [vmem:[#allocation2] ss:$0 sm:$0xff] }
  0xe4   :  { %v167_v38 = vmul.f32 0.70710677, %v163_v35  ;;  %v221_v31 = vmul.f32 0.5, %v163_v35 }
  0xe5   :  { %v166_v39 = vmul.f32 0.70710677, %v158_v37  ;;  %v220_v29 = vmul.f32 0.5, %v158_v37 }
  0xe6   :  { %v394_v40 = vclamps-f32 %v167_v38, 4.0 }
  0xe7   :  { %v393_v41 = vclamps-f32 %v166_v39, 4.0  ;;  %v497_v39 = vmov 0.0  }
  0xe8   :  { %v173_v42 = vmul.f32 %v394_v40, %v394_v40 }
  0xe9   :  { %v172_v43 = vmul.f32 %v393_v41, %v393_v41 }
  0xea   :  { %v193_v44 = vmul.f32 -1.1791603e-07, %v173_v42  ;;  %v175_v45 = vmul.f32 0.00022905065, %v173_v42 }
  0xeb   :  { %v192_v46 = vmul.f32 -1.1791603e-07, %v172_v43  ;;  %v174_v48 = vmul.f32 0.00022905065, %v172_v43 }
  0xec   :  { %v195_v47 = vadd.f32 2.3547966e-05, %v193_v44  ;;  %v177_v51 = vadd.f32 0.003408291, %v175_v45 }
  0xed   :  { %v194_v49 = vadd.f32 2.3547966e-05, %v192_v46  ;;  %v176_v54 = vadd.f32 0.003408291, %v174_v48 }
  0xee   :  { %v197_v50 = vmul.f32 %v195_v47, %v173_v42  ;;  %v179_v57 = vmul.f32 %v177_v51, %v173_v42 }
  0xef   :  { %v196_v52 = vmul.f32 %v194_v49, %v172_v43  ;;  %v178_v60 = vmul.f32 %v176_v54, %v172_v43  ;;  %v395_v54 = vld [vmem:[%s629_s6] ss:$0 sm:$0xff]  ;;  %s472_s6 = scalar_lea.vmem %s376_s24, 256 }
  0xf0   :  { %v199_v53 = vadd.f32 0.0010179626, %v197_v50  ;;  %v181_v63 = vadd.f32 0.050955694, %v179_v57  ;;  %p473_p0 = scmp.ne.s32.totalorder %s376_s24, %s472_s6  ;;  %p478_p2 = scmp.lt.s32.totalorder %s472_s6, %s472_s6 }
  0xf1   :  { %v198_v55 = vadd.f32 0.0010179626, %v196_v52  ;;  %v180_v2 = vadd.f32 0.050955694, %v178_v60 }
  0xf2   :  { %v201_v56 = vmul.f32 %v199_v53, %v173_v42  ;;  %v183_v5 = vmul.f32 %v181_v63, %v173_v42  ;;  %p479_p3 = por %p478_p2, %p477_p1 }
  0xf3   :  { %v200_v58 = vmul.f32 %v198_v55, %v172_v43  ;;  %v182_v10 = vmul.f32 %v180_v2, %v172_v43 }
  0xf4   :  { %v203_v59 = vadd.f32 0.01407047, %v201_v56  ;;  %v185_v13 = vadd.f32 0.18520832, %v183_v5  ;;  %p480_p4 = pnand %p479_p3, %p473_p0 }
  0xf5   :  { %v202_v61 = vadd.f32 0.01407047, %v200_v58  ;;  %v184_v16 = vadd.f32 0.18520832, %v182_v10 }
  0xf6   :  { %v205_v62 = vmul.f32 %v203_v59, %v173_v42  ;;  %v187_v18 = vmul.f32 %v185_v13, %v173_v42 }
  0xf7   :  { %v204_v0 = vmul.f32 %v202_v61, %v172_v43  ;;  %v186_v19 = vmul.f32 %v184_v16, %v172_v43 }
  0xf8   :  { %v207_v1 = vadd.f32 0.11098505, %v205_v62  ;;  %v189_v20 = vadd.f32 1.1283791, %v187_v18 }
  0xf9   :  { %v206_v3 = vadd.f32 0.11098505, %v204_v0  ;;  %v188_v21 = vadd.f32 1.1283791, %v186_v19 }
  0xfa   :  { %v209_v4 = vmul.f32 %v207_v1, %v173_v42  ;;  %v191_v22 = vmul.f32 %v394_v40, %v189_v20 }
  0xfb   :  { %v208_v8 = vmul.f32 %v206_v3, %v172_v43  ;;  %v190_v24 = vmul.f32 %v393_v41, %v188_v21 }
  0xfc   :  { %v211_v9 = vadd.f32 0.49746925, %v209_v4 }
  0xfd   :  { %v210_v11 = vadd.f32 0.49746925, %v208_v8 }
  0xfe   :  { %v213_v12 = vmul.f32 %v211_v9, %v173_v42 }
  0xff   :  { %v212_v14 = vmul.f32 %v210_v11, %v172_v43 }
 0x100   :  { %v215_v15 = vadd.f32 1.0, %v213_v12 }
 0x101   :  { %v214_v17 = vadd.f32 1.0, %v212_v14 }
 0x102   :  { %464 = vrcp.f32 %v215_v15 }
 0x103   :  { %466 = vrcp.f32 %v214_v17 }
 0x10c   :  { %v465_v23 = vpop.eup %464 }
 0x10d   :  { %v467_v25 = vpop.eup %466  ;;  %v219_v26 = vmul.f32 %v465_v23, %v191_v22 }
 0x10e   :  { %v218_v27 = vmul.f32 %v467_v25, %v190_v24 }
 0x10f   :  { %v223_v28 = vadd.f32 1.0, %v219_v26 }
 0x110   :  { %v222_v30 = vadd.f32 1.0, %v218_v27 }
 0x111   :  { %v225_v34 = vmul.f32 %v223_v28, %v221_v31 }
 0x112   :  { %v224_v33 = vmul.f32 %v222_v30, %v220_v29 }
 0x114   :  { %429 = vmatprep.mubr.msk.f32.mxu1 %vm33_vm0, %v224_v33 }
 0x115   :  { %430 = vmatmul.mubr.msk.f32.vlgmr.msra.gmra.mrb[0].mxu1 %vm33_vm0, %v225_v34 }
 0x135   :  { %v57_v38 = vpop.xlane.xlu1 %56 }
 0x136   :  { %vm68_vm1 = vcmp.gt.f32.partialorder %v57_v38, %v387_v36 }
 0x137   :  { %v388_v40 = vsel %vm68_vm1, 1.0, %v497_v39 }
 0x138   :  { %v320_v42 = vadd.f32 1e-12, %v388_v40  ;;  %vm352_vm2 = vcmp.eq.f32.partialorder %v388_v40, 0.0  ;;  %vm318_vm4 = vcmp.gt.f32.partialorder %v388_v40, 0.0 }
 0x139   :  { %v60_v41 = vpop.xlane.xlu1 %59  ;;  %v354_v43 = vsel %vm352_vm2, 1, %v496_v32 }
 0x13a   :  { %468 = vrcp.f32 %v320_v42  ;;  %vm69_vm3 = vcmp.gt.f32.partialorder %v60_v41, %v387_v36  ;;  %357 = vperm.xlu1 %459, %v354_v43  }
 0x13b   :  { %v389_v35 = vsel %vm69_vm3, 1.0, %v497_v39 }
 0x13c   :  { %v321_v37 = vadd.f32 1e-12, %v389_v35  ;;  %v454_v44 = vpack.i.bf16 %v389_v35, %v388_v40  ;;  %vm319_vm5 = vcmp.gt.f32.partialorder %v389_v35, 0.0  ;;  %vm353_vm6 = vcmp.eq.f32.partialorder %v389_v35, 0.0 }
 0x13d   :  { %v355_v49 = vsel %vm353_vm6, 1, %v496_v32 }
 0x13e   :  { %470 = vrcp.f32 %v321_v37  ;;  %455 = vperm.xlu0 %453, %v454_v44  }
 0x144   :  { %v469_v45 = vpop.eup %468 }
 0x145   :  { %v326_v46 = vsel %vm318_vm4, %v469_v45, 1.0 }
 0x146   :  { %342 = vperm.xlu1 %459, %v326_v46  }
 0x148   :  { %v471_v47 = vpop.eup %470 }
 0x149   :  { %v327_v48 = vsel %vm319_vm5, %v471_v47, 1.0 }
 0x14a   :  { %347 = vperm.xlu1 %459, %v327_v48  }
 0x14e   :  { %360 = vperm.xlu1 %459, %v355_v49  }
 0x1b9   :  { %v358_v50 = vpop.permute.xlu1 %357 }
 0x1ba   :  { %vm362_vm8 = vcmp.eq.s32.totalorder %v358_v50, 1 }
 0x1bd   :  { %v456_v53 = vpop.permute.xlu0 %455 }
 0x1be   :  { %v458_v56 = vunpack.i.h.bf16 %v456_v53  ;;  %v457_v59 = vunpack.i.l.bf16 %v456_v53 }
 0x1c5   :  { %v343_v51 = vpop.permute.xlu1 %342 }
 0x1c9   :  { %v348_v52 = vpop.permute.xlu1 %347 }
 0x1cd   :  { %v361_v61 = vpop.permute.xlu1 %360 }
 0x1ce   :  { %vm363_vm7 = vcmp.eq.s32.totalorder %v361_v61, 1 }
 0x1e8   :  { %v431_v55 = vpop.f32.mrb[0].mxu1 }
 0x1e9   :  { %v315_v57 = vadd.f32 %v431_v55, %v395_v54  ;;  %v309_v58 = vpop.f32.mrb[1].mxu1 }
 0x1ea   :  { %v310_v60 = vadd.f32 %v395_v54, %v309_v58 }
 0x1eb   :  { %v339_v62 = vmul.f32 %v458_v56, %v315_v57 }
 0x1ec   :  { %v338_v63 = vmul.f32 %v457_v59, %v310_v60 }
 0x1ed   :  { %v351_v0 = vmul.f32 %v348_v52, %v339_v62 }
 0x1ee   :  { %v350_v32 = vmul.f32 %v343_v51, %v338_v63 }
 0x1ef   :  { %v365_v1 = vsel %vm363_vm7, %v315_v57, %v351_v0 }
 0x1f0   :  { %v367_v2 = vadd.f32 %v365_v1, %v564_v7  ;;  %v364_v3 = vsel %vm362_vm8, %v310_v60, %v350_v32 }
 0x1f1   :  { %v366_v4 = vadd.f32 %v364_v3, %v559_v6 }
 0x1f2   :  { %369 = vst.msk [vmem:[#allocation3 + $0x8] sm:$0xff] %vm33_vm0, %v367_v2 }
 0x1f3   :  { %368 = vst.msk [vmem:[#allocation3] sm:$0xff] %vm33_vm0, %v366_v4 }
 0x1f4   :  { %483 = shalt.err (!%p480_p4)
}
 0x1f5   :  { %s484_s27 = scalar_lea.hbm %s630_s7, 256 }
 0x1f6   :  { %p485_p5 = scmp.ne.s32.totalorder %s630_s7, %s484_s27  ;;  %p488_p6 = scmp.lt.u32.totalorder %s484_s27, %s630_s7 }
 0x1f8   :  { %p490_p7 = pnand %p488_p6, %p485_p5 }
 0x1fa   :  { %493 = shalt.err (!%p490_p7)
}
 0x1fb   :  { %s499_s9 = smov 128   ;;  %s500_s10 = smov 8  }
 0x1fc   :  { %381 = dma.vmem_to_hbm [thread:$0]  %s376_s24, 256, %s630_s7, [#allocation4], %s499_s9, %s499_s9, %s500_s10  }
 0x1fd   :  { %494 = dma.done.wait [#allocation4], 256  }
 0x1fe   :  { %495 = vsyncadd [#allocation4], 4294967040 }
 0x1ff   :  { %385 = vsyncpa [#allocation4], 1 }

// kernel: transformer_with_dynmoe.3
= control target key start
LH: loop header
LB: loop body
LE: loop exit
PB: predicated region body
PF: predicated region fallthrough
CT: control target
= control target key end

     0   :  { %s2270_s24 = smov 0   ;;  %s2492_s0 = inlined_call_operand.vmem [shape: f32[2,8,32], index: 0, kind: input, shape index: {}]   ;;  %s2493_s1 = inlined_call_operand.vmem [shape: f32[32,96], index: 1, kind: input, shape index: {}]   ;;  %s2494_s2 = inlined_call_operand.vmem [shape: f32[1,96], index: 2, kind: input, shape index: {}]   ;;  %s2495_s3 = inlined_call_operand.vmem [shape: f32[32,32], index: 3, kind: input, shape index: {}]   ;;  %s2496_s4 = inlined_call_operand.vmem [shape: f32[1,32], index: 4, kind: input, shape index: {}]   ;;  %s2497_s5 = inlined_call_operand.vmem [shape: f32[1,32], index: 5, kind: input, shape index: {}]   ;;  %s2498_s6 = inlined_call_operand.vmem [shape: f32[1,32], index: 6, kind: input, shape index: {}]   ;;  %s2499_s7 = inlined_call_operand.vmem [shape: f32[2,8,32], index: 7, kind: output, shape index: {}]  }
   0x1 LB: > { %s1919_s25 = sadd.s32 4294967295, %s2195_s24   ;;  %p1923_p0 = scmp.ge.s32.totalorder %s2195_s24, 1  ;;  %s2195_s24 = sphi %s2270_s24, %s17_s24  }
   0x2   : > { %p236_p1 = scmp.lt.s32.totalorder %s2195_s24, 3 }
   0x4   : > { %p237_p2 = pnand %p1923_p0, %p236_p1 }
   0x5   : > { %v275_v0 = vld [vmem:[%s2493_s1] sm:$0xff] (!%p237_p2)  ;;  %v276_v1 = vld [vmem:[%s2493_s1 + $0x8] sm:$0xff] (!%p237_p2)  ;;  %v277_v2 = vld [vmem:[%s2493_s1 + $0x10] sm:$0xff] (!%p237_p2)  ;;  %v2197_v3 = vmov (!%p237_p2), 0.0|0.0   ;;  %vm2198_vm0 = vmmov (!%p237_p2), 0   ;;  %v2199_v6 = vmov (!%p237_p2), 0.0  }
   0x6   : > { %240 = sbr.rel (%p237_p2) target bundleno = 2322 (0x912), region = 48  ;;  %2102 = vmatprep.subr.bf16.mxu0 (!%p237_p2), %v2197_v3  ;;  %v2103_v4 = vpack.c.bf16 (!%p237_p2), %v276_v1, %v275_v0  ;;  %v278_v5 = vld [vmem:[%s2493_s1 + $0x18] sm:$0xff] (!%p237_p2)  ;;  %2008 = vmatprep.mubr.msk.f32.mxu0 (!%p237_p2), %vm2198_vm0, %v2199_v6  ;;  %p266_p3 = scmp.lt.s32.totalorder (!%p237_p2), %s1919_s25, 1  ;;  %vm286_vm1 = vcmask (!%p237_p2), 261120   ;;  %v1926_v9 = vld [vmem:[%s2494_s2] ss:$0 sm:$0xff] (!%p237_p2) }
   0x7   : > { %2011 = vmatprep.subr.mxu1 (!%p237_p2), %v2199_v6  ;;  %2013 = vmatprep.mubr.msk.f32.mxu1 (!%p237_p2), %vm2198_vm0, %v2199_v6  ;;  %v2106_v7 = vpack.c.bf16 (!%p237_p2), %v278_v5, %v277_v2  ;;  %vm360_vm2 = vcmask (!%p237_p2), 785408   ;;  %s2200_s17 = smov (!%p237_p2), 64   ;;  %s2201_s18 = smov (!%p237_p2), 96   ;;  %vm366_vm3 = vcmask (!%p237_p2), 31744   ;;  %vm442_vm4 = vcmask (!%p237_p2), 64512  }
   0x8   : > { %2104 = vmatpush3.bf16.msra.mxu0 (!%p237_p2), %v2103_v4  ;;  %s2202_s19 = smov (!%p237_p2), 92   ;;  %s2203_s20 = smov (!%p237_p2), 124   ;;  %vm703_vm5 = vcmask (!%p237_p2), 64544   ;;  %vm877_vm6 = vcmask (!%p237_p2), 97344   ;;  %vm1051_vm7 = vcmask (!%p237_p2), 130144   ;;  %vm1225_vm8 = vcmask (!%p237_p2), 162944  }
   0x9   : > { %2105 = vmatprep.subr.bf16.mxu0 (!%p237_p2), %v2197_v3  ;;  %s2204_s21 = smov (!%p237_p2), 88   ;;  %s2205_s22 = smov (!%p237_p2), 120   ;;  %vm1399_vm9 = vcmask (!%p237_p2), 195744   ;;  %vm1573_vm10 = vcmask (!%p237_p2), 228544   ;;  %vm1747_vm11 = vcmask (!%p237_p2), 261344  }
   0xa   : > { %s2206_s23 = smov (!%p237_p2), 116   ;;  %s2207_s26 = smov (!%p237_p2), 84  }
   0xb   : > { %s2208_s27 = smov (!%p237_p2), 72   ;;  %s2209_s28 = smov (!%p237_p2), 68  }
   0xc   : > { %2107 = vmatpush3.bf16.msra.mxu0 (!%p237_p2), %v2106_v7  ;;  %s2210_s29 = smov (!%p237_p2), 80   ;;  %s2211_s30 = smov (!%p237_p2), 112  }
   0xd   : > { %s2501_s25 = smov (!%p266_p3, %s1919_s25), 1  ;;  %2031 = vmatprep.subr.mxu0 %v2199_v6  ;;  %s2212_s8 = smov 76  }
   0xe   : > { %s1924_s11 = sshll.u32 %s2501_s25, 3  ;;  %s2213_s9 = smov 108  }
   0xf   : > { %s269_s14 = scalar_lea.vmem %s2492_s0, %s1924_s11  ;;  %s2214_s10 = smov 104  }
  0x10   : > { %v2305_v8 = vld [vmem:[%s269_s14] sm:$0xff]  ;;  %s2215_s12 = smov 100   ;;  %s2216_s13 = smov 60  }
  0x11   : > { %2009 = vmatmul.mubr.msk.f32.vlgmr.msra.gmra.mrb[0].mxu0 %vm286_vm1, %v2305_v8  ;;  %s2217_s14 = smov 52   ;;  %s2218_s15 = smov 48  }
  0x12   : > { %2033 = vmatprep.mubr.msk.f32.mxu0 %vm2198_vm0, %v2199_v6  ;;  %s2219_s16 = smov 56  }
  0xe4   : > { %v356_v10 = vpop.f32.mrb[0].mxu0 }
  0xe5   : > { %v357_v11 = vadd.f32 %v1926_v9, %v356_v10  ;;  %v2010_v12 = vpop.f32.mrb[1].mxu0 }
  0xe7   : > { %361 = vst.msk [vmem:[#allocation2] sm:$0xff] %vm360_vm2, %v357_v11 }
  0xee   : > { %v2315_v13 = vld [vmem:[#allocation2] sm:$0xff] }
  0xef   : > { %454 = vrot.lane.b32.xlu1 %v2315_v13, %s2200_s17  ;;  %364 = vrot.lane.b32.xlu0 %v2315_v13, %s2201_s18  ;;  %s2220_s17 = smov 40   ;;  %s2221_s18 = smov 44  }
  0xf3   : > { %535 = vrot.lane.b32.xlu1 %v2315_v13, %s2202_s19  ;;  %s2222_s19 = smov 36  }
  0xf7   : > { %533 = vrot.lane.b32.xlu1 %v2315_v13, %s2203_s20  ;;  %s2223_s20 = smov 4  }
  0xfb   : > { %709 = vrot.lane.b32.xlu1 %v2315_v13, %s2204_s21  ;;  %s2224_s21 = smov 8  }
  0xff   : > { %707 = vrot.lane.b32.xlu1 %v2315_v13, %s2205_s22  ;;  %s2225_s22 = smov 12  }
 0x103   : > { %881 = vrot.lane.b32.xlu1 %v2315_v13, %s2206_s23  ;;  %s273_s23 = scalar_lea.vmem %s2499_s7, %s1924_s11 }
 0x161   : > { %v455_v14 = vpop.permute.xlu1 %454  ;;  %v365_v15 = vpop.permute.xlu0 %364 }
 0x162   : > { %2012 = vmatpush3.xpose.msk.msra.mxu1 %vm366_vm3, %v365_v15 }
 0x163   : > { %2016 = vmatprep.subr.mxu1 %v2199_v6 }
 0x165   : > { %v2326_v16 = vpop.permute.xlu1 %535  ;;  %2014 = vmatmul.mubr.msk.f32.vlgmr.msra.gmra.mrb[0].mxu1 %vm366_vm3, %v2315_v13 }
 0x166   : > { %2017 = vmatpush3.msra.mxu1 %v455_v14  ;;  %2018 = vmatprep.mubr.msk.f32.mxu1 %vm2198_vm0, %v2199_v6 }
 0x167   : > { %2021 = vmatprep.subr.mxu1 %v2199_v6 }
 0x169   : > { %v2333_v17 = vpop.permute.xlu1 %533 }
 0x16d   : > { %v710_v18 = vpop.permute.xlu1 %709 }
 0x16e   : > { %2032 = vmatpush3.xpose.msk.msra.mxu0 %vm366_vm3, %v710_v18 }
 0x16f   : > { %2041 = vmatprep.subr.mxu0 %v2199_v6 }
 0x171   : > { %v708_v19 = vpop.permute.xlu1 %707 }
 0x172   : > { %2034 = vmatmul.mubr.msk.f32.vlgmr.msra.gmra.mrb[2].mxu0 %vm366_vm3, %v708_v19 }
 0x173   : > { %2043 = vmatprep.mubr.msk.f32.mxu0 %vm2198_vm0, %v2199_v6 }
 0x175   : > { %v882_v30 = vpop.permute.xlu1 %881 }
 0x238   : > { %v437_v20 = vpop.f32.mrb[0].mxu1 }
 0x239   : > { %v441_v21 = vmul.f32 0.5, %v437_v20  ;;  %v2015_v22 = vpop.f32.mrb[1].mxu1 }
 0x23b   : > { %v443_v23 = vsel %vm442_vm4, %v441_v21, -inf }
 0x23c   : > { %444 = vmax.xlane.f32.xlu0 %v443_v23 }
 0x245   : > { %v781_v24 = vpop.f32.mrb[2].mxu0 }
 0x246   : > { %v2035_v25 = vpop.f32.mrb[3].mxu0  ;;  %v785_v33 = vmul.f32 0.5, %v781_v24 }
 0x248   : > { %v786_v34 = vsel %vm442_vm4, %v785_v33, -inf }
 0x252   : > { %883 = vrot.lane.b32.xlu0 %v2315_v13, %s2207_s26 }
 0x256   : > { %1405 = vrot.lane.b32.xlu0 %v2315_v13, %s2208_s27 }
 0x25a   : > { %1579 = vrot.lane.b32.xlu0 %v2315_v13, %s2209_s28 }
 0x2c9   : > { %v445_v26 = vpop.xlane.xlu0 %444 }
 0x2ca   : > { %v446_v27 = vsub.f32 %v441_v21, %v445_v26 }
 0x2cc   : > { %v447_v28 = vmul.f32 1.442695, %v446_v27 }
 0x2cd   : > { %v884_v29 = vpop.permute.xlu0 %883 }
 0x2ce   : > { %2155 = vpow2.f32 %v447_v28  ;;  %2042 = vmatpush3.xpose.msk.msra.mxu0 %vm366_vm3, %v884_v29 }
 0x2cf   : > { %2051 = vmatprep.subr.mxu0 %v2199_v6 }
 0x2d1   : > { %2044 = vmatmul.mubr.msk.f32.vlgmr.msra.gmra.mrb[4].mxu0 %vm366_vm3, %v882_v30  ;;  %v1406_v41 = vpop.permute.xlu0 %1405 }
 0x2d2   : > { %2053 = vmatprep.mubr.msk.f32.mxu0 %vm2198_vm0, %v2199_v6 }
 0x2d5   : > { %v1580_v44 = vpop.permute.xlu0 %1579 }
 0x2d8   : > { %v2156_v31 = vpop.eup %2155 }
 0x2d9   : > { %v449_v32 = vsel %vm442_vm4, %v2156_v31, 0.0 }
 0x2da   : > { %450 = vadd.xlane.f32.xlu1 %v449_v32 }
 0x2eb   : > { %1057 = vrot.lane.b32.xlu1 %v2315_v13, %s2210_s29 }
 0x2ef   : > { %1055 = vrot.lane.b32.xlu1 %v2315_v13, %s2211_s30 }
 0x2f3   : > { %1231 = vrot.lane.b32.xlu1 %v2315_v13, %s2212_s8  ;;  %s2226_s8 = smov 16  }
 0x2f7   : > { %1229 = vrot.lane.b32.xlu1 %v2315_v13, %s2213_s9 }
 0x2fb   : > { %1403 = vrot.lane.b32.xlu1 %v2315_v13, %s2214_s10 }
 0x2ff   : > { %1577 = vrot.lane.b32.xlu1 %v2315_v13, %s2215_s12  ;;  %s2227_s12 = smov 20  }
 0x323   : > { %787 = vmax.xlane.f32.xlu1 %v786_v34 }
 0x367   : > { %v451_v35 = vpop.xlane.xlu1 %450 }
 0x368   : > { %2157 = vrcp.f32 %v451_v35 }
 0x36b   : > { %v1058_v36 = vpop.permute.xlu1 %1057 }
 0x36c   : > { %2052 = vmatpush3.xpose.msk.msra.mxu0 %vm366_vm3, %v1058_v36 }
 0x36d   : > { %2061 = vmatprep.subr.mxu0 %v2199_v6 }
 0x36f   : > { %v1056_v37 = vpop.permute.xlu1 %1055 }
 0x370   : > { %2054 = vmatmul.mubr.msk.f32.vlgmr.msra.gmra.mrb[6].mxu0 %vm366_vm3, %v1056_v37 }
 0x371   : > { %2063 = vmatprep.mubr.msk.f32.mxu0 %vm2198_vm0, %v2199_v6 }
 0x372   : > { %v2158_v38 = vpop.eup %2157 }
 0x373   : > { %v453_v39 = vmul.f32 %v2158_v38, %v2156_v31  ;;  %v1232_v40 = vpop.permute.xlu1 %1231 }
 0x374   : > { %2062 = vmatpush3.xpose.msk.msra.mxu0 %vm366_vm3, %v1232_v40 }
 0x375   : > { %2019 = vmatmul.mubr.msk.f32.vlgmr.msra.gmra.mrb[2].mxu1 %vm442_vm4, %v453_v39  ;;  %2071 = vmatprep.subr.mxu0 %v2199_v6 }
 0x376   : > { %2022 = vmatpush3.xpose.msk.msra.mxu1 %vm366_vm3, %v2326_v16  ;;  %2023 = vmatprep.mubr.msk.f32.mxu1 %vm2198_vm0, %v2199_v6 }
 0x377   : > { %v1230_v42 = vpop.permute.xlu1 %1229  ;;  %2026 = vmatprep.subr.mxu1 %v2199_v6 }
 0x378   : > { %2064 = vmatmul.mubr.msk.f32.vlgmr.msra.gmra.mrb[8].mxu0 %vm366_vm3, %v1230_v42 }
 0x379   : > { %2072 = vmatpush3.xpose.msk.msra.mxu0 %vm366_vm3, %v1406_v41  ;;  %2024 = vmatmul.mubr.msk.f32.vlgmr.msra.gmra.mrb[4].mxu1 %vm366_vm3, %v2333_v17 }
 0x37a   : > { %2073 = vmatprep.mubr.msk.f32.mxu0 %vm2198_vm0, %v2199_v6  ;;  %2081 = vmatprep.subr.mxu0 %v2199_v6 }
 0x37b   : > { %v1404_v43 = vpop.permute.xlu1 %1403  ;;  %2028 = vmatprep.mubr.msk.f32.mxu1 %vm2198_vm0, %v2199_v6 }
 0x37c   : > { %2074 = vmatmul.mubr.msk.f32.vlgmr.msra.gmra.mrb[10].mxu0 %vm366_vm3, %v1404_v43 }
 0x37d   : > { %2082 = vmatpush3.xpose.msk.msra.mxu0 %vm366_vm3, %v1580_v44  ;;  %2083 = vmatprep.mubr.msk.f32.mxu0 %vm2198_vm0, %v2199_v6 }
 0x37e   : > { %2108 = vmatprep.subr.bf16.mxu0 %v2197_v3 }
 0x37f   : > { %v1578_v45 = vpop.permute.xlu1 %1577 }
 0x380   : > { %2084 = vmatmul.mubr.msk.f32.vlgmr.msra.gmra.mrb[12].mxu0 %vm366_vm3, %v1578_v45 }
 0x381   : > { %2099 = vmatprep.mubr.msk.f32.mxu0 %vm2198_vm0, %v2199_v6 }
 0x3a4   : > { %v955_v46 = vpop.f32.mrb[4].mxu0 }
 0x3a5   : > { %v2045_v47 = vpop.f32.mrb[5].mxu0  ;;  %v959_v62 = vmul.f32 0.5, %v955_v46 }
 0x3a7   : > { %v960_v5 = vsel %vm442_vm4, %v959_v62, -inf }
 0x3b0   : > { %v788_v48 = vpop.xlane.xlu1 %787 }
 0x3b1   : > { %v789_v51 = vsub.f32 %v785_v33, %v788_v48 }
 0x3b3   : > { %v790_v53 = vmul.f32 1.442695, %v789_v51 }
 0x3b5   : > { %2159 = vpow2.f32 %v790_v53 }
 0x3bf   : > { %v2392_v11 = vpop.eup %2159 }
 0x3c0   : > { %v792_v15 = vsel %vm442_vm4, %v2392_v11, 0.0 }
 0x443   : > { %v1129_v49 = vpop.f32.mrb[6].mxu0 }
 0x444   : > { %v2055_v50 = vpop.f32.mrb[7].mxu0  ;;  %v1133_v2 = vmul.f32 0.5, %v1129_v49 }
 0x446   : > { %v1134_v14 = vsel %vm442_vm4, %v1133_v2, -inf }
 0x448   : > { %v526_v52 = vpop.f32.mrb[2].mxu1 }
 0x449   : > { %530 = vst.msk [vmem:[#allocation3] sm:$0xff] %vm366_vm3, %v526_v52  ;;  %v2020_v54 = vpop.f32.mrb[3].mxu1 }
 0x44b   : > { %v1303_v55 = vpop.f32.mrb[8].mxu0 }
 0x44c   : > { %v1307_v56 = vmul.f32 0.5, %v1303_v55  ;;  %v607_v57 = vpop.f32.mrb[4].mxu1  ;;  %v2065_v58 = vpop.f32.mrb[9].mxu0 }
 0x44d   : > { %v611_v59 = vmul.f32 0.5, %v607_v57  ;;  %v2025_v60 = vpop.f32.mrb[5].mxu1 }
 0x44e   : > { %v1308_v61 = vsel %vm442_vm4, %v1307_v56, -inf }
 0x44f   : > { %1309 = vmax.xlane.f32.xlu1 %v1308_v61  ;;  %v1477_v63 = vpop.f32.mrb[10].mxu0  ;;  %v612_v0 = vsel %vm442_vm4, %v611_v59, -inf }
 0x450   : > { %613 = vmax.xlane.f32.xlu0 %v612_v0  ;;  %v2075_v1 = vpop.f32.mrb[11].mxu0  ;;  %v1481_v12 = vmul.f32 0.5, %v1477_v63 }
 0x452   : > { %v1482_v16 = vsel %vm442_vm4, %v1481_v12, -inf }
 0x453   : > { %v1651_v4 = vpop.f32.mrb[12].mxu0 }
 0x454   : > { %v1655_v7 = vmul.f32 0.5, %v1651_v4  ;;  %961 = vmax.xlane.f32.xlu0 %v960_v5  ;;  %v2085_v9 = vpop.f32.mrb[13].mxu0 }
 0x456   : > { %v1656_v10 = vsel %vm442_vm4, %v1655_v7, -inf }
 0x457   : > { %1657 = vmax.xlane.f32.xlu1 %v1656_v10 }
 0x458   : > { %1135 = vmax.xlane.f32.xlu0 %v1134_v14 }
 0x45b   : > { %793 = vadd.xlane.f32.xlu1 %v792_v15 }
 0x45c   : > { %1483 = vmax.xlane.f32.xlu0 %v1482_v16 }
 0x4dc   : > { %v1310_v17 = vpop.xlane.xlu1 %1309 }
 0x4dd   : > { %v614_v18 = vpop.xlane.xlu0 %613  ;;  %v1311_v19 = vsub.f32 %v1307_v56, %v1310_v17 }
 0x4de   : > { %v615_v28 = vsub.f32 %v611_v59, %v614_v18 }
 0x4df   : > { %v1312_v22 = vmul.f32 1.442695, %v1311_v19 }
 0x4e0   : > { %v616_v33 = vmul.f32 1.442695, %v615_v28 }
 0x4e1   : > { %v962_v20 = vpop.xlane.xlu0 %961 }
 0x4e2   : > { %v963_v21 = vsub.f32 %v959_v62, %v962_v20 }
 0x4e4   : > { %v964_v23 = vmul.f32 1.442695, %v963_v21  ;;  %v1658_v24 = vpop.xlane.xlu1 %1657  ;;  %v1751_v21 = vld [vmem:[%s2495_s3 + $0x8] sm:$0xff] }
 0x4e5   : > { %v1659_v25 = vsub.f32 %v1655_v7, %v1658_v24  ;;  %v1136_v26 = vpop.xlane.xlu0 %1135 }
 0x4e6   : > { %2161 = vpow2.f32 %v964_v23  ;;  %v1137_v27 = vsub.f32 %v1133_v2, %v1136_v26 }
 0x4e7   : > { %2163 = vpow2.f32 %v1312_v22  ;;  %v1660_v29 = vmul.f32 1.442695, %v1659_v25  ;;  %v1752_v22 = vld [vmem:[%s2495_s3 + $0x10] sm:$0xff]  ;;  %v1753_v25 = vld [vmem:[%s2495_s3 + $0x18] sm:$0xff] }
 0x4e8   : > { %v1138_v30 = vmul.f32 1.442695, %v1137_v27  ;;  %v794_v47 = vpop.xlane.xlu1 %793  ;;  %v2112_v26 = vpack.c.bf16 %v1753_v25, %v1752_v22 }
 0x4e9   : > { %v1484_v31 = vpop.xlane.xlu0 %1483 }
 0x4ea   : > { %2165 = vpow2.f32 %v1138_v30  ;;  %v1485_v32 = vsub.f32 %v1481_v12, %v1484_v31 }
 0x4eb   : > { %2167 = vpow2.f32 %v1660_v29 }
 0x4ec   : > { %v1486_v34 = vmul.f32 1.442695, %v1485_v32 }
 0x4ee   : > { %2169 = vpow2.f32 %v1486_v34 }
 0x4ef   : > { %2171 = vpow2.f32 %v616_v33 }
 0x4f0   : > { %v2398_v35 = vpop.eup %2161 }
 0x4f1   : > { %v966_v36 = vsel %vm442_vm4, %v2398_v35, 0.0  ;;  %v2402_v37 = vpop.eup %2163 }
 0x4f2   : > { %967 = vadd.xlane.f32.xlu0 %v966_v36  ;;  %v1314_v39 = vsel %vm442_vm4, %v2402_v37, 0.0 }
 0x4f4   : > { %v2404_v38 = vpop.eup %2165 }
 0x4f5   : > { %v1140_v40 = vsel %vm442_vm4, %v2404_v38, 0.0  ;;  %v2410_v41 = vpop.eup %2167 }
 0x4f6   : > { %1315 = vadd.xlane.f32.xlu0 %v1314_v39  ;;  %1141 = vadd.xlane.f32.xlu1 %v1140_v40  ;;  %v1662_v44 = vsel %vm442_vm4, %v2410_v41, 0.0  ;;  %v1952_v40 = vld [vmem:[%s2496_s4] ss:$0 sm:$0xff] }
 0x4f8   : > { %v2412_v42 = vpop.eup %2169 }
 0x4f9   : > { %v1488_v43 = vsel %vm442_vm4, %v2412_v42, 0.0  ;;  %v2172_v45 = vpop.eup %2171 }
 0x4fa   : > { %1489 = vadd.xlane.f32.xlu1 %v1488_v43  ;;  %1663 = vadd.xlane.f32.xlu0 %v1662_v44  ;;  %v618_v46 = vsel %vm442_vm4, %v2172_v45, 0.0 }
 0x4fe   : > { %619 = vadd.xlane.f32.xlu0 %v618_v46 }
 0x50b   : > { %623 = vrot.lane.b32.xlu1 %v2315_v13, %s2216_s13  ;;  %s2228_s13 = smov 24  }
 0x50f   : > { %971 = vrot.lane.b32.xlu1 %v2315_v13, %s2217_s14  ;;  %s2229_s14 = smov 28  }
 0x513   : > { %1145 = vrot.lane.b32.xlu1 %v2315_v13, %s2218_s15 }
 0x514   : > { %797 = vrot.lane.b32.xlu0 %v2315_v13, %s2219_s16 }
 0x517   : > { %1493 = vrot.lane.b32.xlu1 %v2315_v13, %s2220_s17 }
 0x518   : > { %1319 = vrot.lane.b32.xlu0 %v2315_v13, %s2221_s18 }
 0x51c   : > { %1667 = vrot.lane.b32.xlu0 %v2315_v13, %s2222_s19 }
 0x57f   : > { %v968_v48 = vpop.xlane.xlu0 %967 }
 0x583   : > { %v1316_v49 = vpop.xlane.xlu0 %1315  ;;  %v1142_v50 = vpop.xlane.xlu1 %1141 }
 0x587   : > { %v1664_v51 = vpop.xlane.xlu0 %1663  ;;  %v1490_v52 = vpop.xlane.xlu1 %1489 }
 0x58b   : > { %v620_v53 = vpop.xlane.xlu0 %619  ;;  %v624_v54 = vpop.permute.xlu1 %623 }
 0x58c   : > { %2173 = vrcp.f32 %v620_v53  ;;  %2027 = vmatpush3.msra.mxu1 %v624_v54 }
 0x58d   : > { %2036 = vmatprep.subr.mxu1 %v2199_v6  ;;  %2175 = vrcp.f32 %v794_v47 }
 0x58e   : > { %2177 = vrcp.f32 %v968_v48 }
 0x58f   : > { %2179 = vrcp.f32 %v1142_v50  ;;  %v798_v58 = vpop.permute.xlu0 %797  ;;  %v972_v59 = vpop.permute.xlu1 %971 }
 0x590   : > { %2181 = vrcp.f32 %v1316_v49 }
 0x591   : > { %2183 = vrcp.f32 %v1490_v52 }
 0x592   : > { %2185 = vrcp.f32 %v1664_v51 }
 0x593   : > { %v1146_v63 = vpop.permute.xlu1 %1145  ;;  %v1320_v2 = vpop.permute.xlu0 %1319 }
 0x596   : > { %v2174_v55 = vpop.eup %2173 }
 0x597   : > { %v622_v56 = vmul.f32 %v2174_v55, %v2172_v45  ;;  %v2176_v57 = vpop.eup %2175  ;;  %v1494_v7 = vpop.permute.xlu1 %1493 }
 0x598   : > { %v796_v13 = vmul.f32 %v2176_v57, %v2392_v11  ;;  %v2178_v60 = vpop.eup %2177  ;;  %v1668_v11 = vpop.permute.xlu0 %1667 }
 0x599   : > { %2029 = vmatmul.mubr.msk.f32.vlgmr.msra.gmra.mrb[6].mxu1 %vm442_vm4, %v622_v56  ;;  %v970_v61 = vmul.f32 %v2178_v60, %v2398_v35  ;;  %v2180_v62 = vpop.eup %2179  ;;  %v1955_v56 = vld [vmem:[%s2498_s6] ss:$0 sm:$0xff] }
 0x59a   : > { %2037 = vmatpush3.msra.mxu1 %v798_v58  ;;  %2038 = vmatprep.mubr.msk.f32.mxu1 %vm2198_vm0, %v2199_v6  ;;  %v1144_v0 = vmul.f32 %v2180_v62, %v2404_v38  ;;  %v2182_v1 = vpop.eup %2181 }
 0x59b   : > { %2046 = vmatprep.subr.mxu1 %v2199_v6  ;;  %v1318_v4 = vmul.f32 %v2182_v1, %v2402_v37  ;;  %v2184_v5 = vpop.eup %2183 }
 0x59c   : > { %v1492_v9 = vmul.f32 %v2184_v5, %v2412_v42  ;;  %v2186_v10 = vpop.eup %2185 }
 0x59d   : > { %2039 = vmatmul.mubr.msk.f32.vlgmr.msra.gmra.mrb[8].mxu1 %vm442_vm4, %v796_v13  ;;  %v1666_v12 = vmul.f32 %v2186_v10, %v2410_v41 }
 0x59e   : > { %2047 = vmatpush3.msra.mxu1 %v972_v59  ;;  %2048 = vmatprep.mubr.msk.f32.mxu1 %vm2198_vm0, %v2199_v6 }
 0x59f   : > { %2056 = vmatprep.subr.mxu1 %v2199_v6 }
 0x5a1   : > { %2049 = vmatmul.mubr.msk.f32.vlgmr.msra.gmra.mrb[10].mxu1 %vm442_vm4, %v970_v61 }
 0x5a2   : > { %2057 = vmatpush3.msra.mxu1 %v1146_v63  ;;  %2058 = vmatprep.mubr.msk.f32.mxu1 %vm2198_vm0, %v2199_v6 }
 0x5a3   : > { %2066 = vmatprep.subr.mxu1 %v2199_v6 }
 0x5a5   : > { %2059 = vmatmul.mubr.msk.f32.vlgmr.msra.gmra.mrb[12].mxu1 %vm442_vm4, %v1144_v0 }
 0x5a6   : > { %2067 = vmatpush3.msra.mxu1 %v1320_v2  ;;  %2068 = vmatprep.mubr.msk.f32.mxu1 %vm2198_vm0, %v2199_v6 }
 0x5a7   : > { %2076 = vmatprep.subr.mxu1 %v2199_v6 }
 0x5a9   : > { %2069 = vmatmul.mubr.msk.f32.vlgmr.msra.gmra.mrb[14].mxu1 %vm442_vm4, %v1318_v4 }
 0x5aa   : > { %2077 = vmatpush3.msra.mxu1 %v1494_v7  ;;  %2078 = vmatprep.mubr.msk.f32.mxu1 %vm2198_vm0, %v2199_v6 }
 0x5ab   : > { %2086 = vmatprep.subr.mxu1 %v2199_v6 }
 0x5ad   : > { %2079 = vmatmul.mubr.msk.f32.vlgmr.msra.gmra.mrb[16].mxu1 %vm442_vm4, %v1492_v9 }
 0x5ae   : > { %2087 = vmatpush3.msra.mxu1 %v1668_v11  ;;  %2088 = vmatprep.mubr.msk.f32.mxu1 %vm2198_vm0, %v2199_v6  ;;  %v1750_v6 = vld [vmem:[%s2495_s3] sm:$0xff] }
 0x5af   : > { %v2109_v24 = vpack.c.bf16 %v1751_v21, %v1750_v6 }
 0x5b1   : > { %2089 = vmatmul.mubr.msk.f32.vlgmr.msra.gmra.mrb[18].mxu1 %vm442_vm4, %v1666_v12  ;;  %2110 = vmatpush3.bf16.msra.mxu0 %v2109_v24 }
 0x5b2   : > { %2111 = vmatprep.subr.bf16.mxu0 %v2197_v3 }
 0x5b5   : > { %2113 = vmatpush3.bf16.msra.mxu0 %v2112_v26 }
 0x66c   : > { %v695_v14 = vpop.f32.mrb[6].mxu1 }
 0x66d   : > { %700 = vrot.lane.b32.xlu1 %v695_v14, %s2223_s20  ;;  %v2030_v15 = vpop.f32.mrb[7].mxu1 }
 0x670   : > { %v869_v16 = vpop.f32.mrb[8].mxu1 }
 0x671   : > { %874 = vrot.lane.b32.xlu0 %v869_v16, %s2224_s21  ;;  %v2040_v17 = vpop.f32.mrb[9].mxu1 }
 0x674   : > { %v1043_v18 = vpop.f32.mrb[10].mxu1 }
 0x675   : > { %1048 = vrot.lane.b32.xlu1 %v1043_v18, %s2225_s22  ;;  %v2050_v19 = vpop.f32.mrb[11].mxu1 }
 0x678   : > { %v1217_v20 = vpop.f32.mrb[12].mxu1 }
 0x679   : > { %1222 = vrot.lane.b32.xlu0 %v1217_v20, %s2226_s8  ;;  %v2060_v23 = vpop.f32.mrb[13].mxu1 }
 0x67c   : > { %v1391_v27 = vpop.f32.mrb[14].mxu1 }
 0x67d   : > { %1396 = vrot.lane.b32.xlu1 %v1391_v27, %s2227_s12  ;;  %v2070_v28 = vpop.f32.mrb[15].mxu1 }
 0x680   : > { %v1565_v29 = vpop.f32.mrb[16].mxu1 }
 0x681   : > { %1570 = vrot.lane.b32.xlu0 %v1565_v29, %s2228_s13  ;;  %v2080_v30 = vpop.f32.mrb[17].mxu1 }
 0x684   : > { %v1739_v31 = vpop.f32.mrb[18].mxu1 }
 0x685   : > { %1744 = vrot.lane.b32.xlu1 %v1739_v31, %s2229_s14  ;;  %v2090_v32 = vpop.f32.mrb[19].mxu1 }
 0x6df   : > { %v701_v33 = vpop.permute.xlu1 %700 }
 0x6e0   : > { %704 = vst.msk [vmem:[#allocation3] sm:$0xff] %vm703_vm5, %v701_v33 }
 0x6e3   : > { %v875_v34 = vpop.permute.xlu0 %874 }
 0x6e4   : > { %878 = vst.msk [vmem:[#allocation3] sm:$0xff] %vm877_vm6, %v875_v34 }
 0x6e7   : > { %v1049_v3 = vpop.permute.xlu1 %1048 }
 0x6e8   : > { %1052 = vst.msk [vmem:[#allocation3] sm:$0xff] %vm1051_vm7, %v1049_v3 }
 0x6eb   : > { %v1223_v35 = vpop.permute.xlu0 %1222 }
 0x6ec   : > { %1226 = vst.msk [vmem:[#allocation3] sm:$0xff] %vm1225_vm8, %v1223_v35 }
 0x6ef   : > { %v1397_v36 = vpop.permute.xlu1 %1396 }
 0x6f0   : > { %1400 = vst.msk [vmem:[#allocation3] sm:$0xff] %vm1399_vm9, %v1397_v36 }
 0x6f3   : > { %v1571_v37 = vpop.permute.xlu0 %1570 }
 0x6f4   : > { %1574 = vst.msk [vmem:[#allocation3] sm:$0xff] %vm1573_vm10, %v1571_v37 }
 0x6f7   : > { %v1745_v38 = vpop.permute.xlu1 %1744 }
 0x6f8   : > { %1748 = vst.msk [vmem:[#allocation3] sm:$0xff] %vm1747_vm11, %v1745_v38 }
 0x6ff   : > { %v1749_v39 = vld [vmem:[#allocation3] sm:$0xff] }
 0x700   : > { %2100 = vmatmul.mubr.msk.f32.vlgmr.msra.gmra.mrb[14].mxu0 %vm286_vm1, %v1749_v39 }
 0x7d3   : > { %v1830_v41 = vpop.f32.mrb[14].mxu0 }
 0x7d4   : > { %v1831_v42 = vadd.f32 %v1952_v40, %v1830_v41  ;;  %v2101_v43 = vpop.f32.mrb[15].mxu0 }
 0x7d6   : > { %v1834_v44 = vadd.f32 %v1831_v42, %v2305_v8  ;;  %v1954_v8 = vld [vmem:[%s2497_s5] ss:$0 sm:$0xff] }
 0x7d8   : > { %v1837_v45 = vsel %vm286_vm1, %v1834_v44, 0.0 }
 0x7d9   : > { %1838 = vadd.xlane.f32.xlu0 %v1837_v45 }
 0x866   : > { %v1839_v46 = vpop.xlane.xlu0 %1838 }
 0x867   : > { %v1841_v47 = vmul.f32 0.03125, %v1839_v46 }
 0x869   : > { %v1842_v48 = vsub.f32 %v1834_v44, %v1841_v47 }
 0x86b   : > { %v1843_v49 = vmul.f32 %v1842_v48, %v1842_v48 }
 0x86d   : > { %v1844_v50 = vsel %vm286_vm1, %v1843_v49, 0.0 }
 0x86e   : > { %1845 = vadd.xlane.f32.xlu1 %v1844_v50 }
 0x8fb   : > { %v1846_v51 = vpop.xlane.xlu1 %1845 }
 0x8fc   : > { %v1847_v52 = vmul.f32 0.03125, %v1846_v51 }
 0x8fe   : > { %v1848_v53 = vadd.f32 1e-05, %v1847_v52 }
 0x900   : > { %2187 = vrsqrt.f32 %v1848_v53 }
 0x90a   : > { %v2188_v54 = vpop.eup %2187 }
 0x90b   : > { %v1850_v55 = vmul.f32 %v2188_v54, %v1842_v48 }
 0x90d   : > { %v1857_v57 = vmul.f32 %v1954_v8, %v1850_v55 }
 0x90f   : > { %v1864_v58 = vadd.f32 %v1955_v56, %v1857_v57 }
 0x911   : > { %1865 = vst.msk [vmem:[%s273_s23] sm:$0xff] %vm286_vm1, %v1864_v58 }
 0x912 PF: > { %s17_s24 = sadd.s32 1, %s2195_s24  }
 0x913   : > { %p14_p4 = scmp.ge.s32.totalorder %s17_s24, 4  }
 0x915   :  { %16 = sbr.rel (!%p14_p4) target bundleno = 1 (0x1), region = 78 }

</bundles_post_ra>
